<compile_context>
chip_gen: v7x
topology: tpu7x:2x2x1
jax: 0.10.0
libtpu: 0.0.40
codegen_flags: <defaults>
</compile_context>

<pallas_src>
import math
import functools

import jax
import jax.numpy as jnp
from jax.experimental import pallas as pl
from jax.experimental.pallas import tpu as pltpu


# Order in which each transformer layer's params are flattened into the
# pallas_call argument list (must match the kernel's unpacking).
LAYER_KEYS = (
    "ln1_g", "ln1_b",
    "w_qkv", "b_qkv",
    "w_out", "b_out",
    "ln2_g", "ln2_b",
    "w_fc1", "b_fc1",
    "w_fc2", "b_fc2",
)


# ------------------------------- fused kernel -------------------------------

def _make_clip_kernel(num_layers, nH, hd, D, L):
    """Builds the fused per-frame CLIP-visual kernel."""
    scale = 1.0 / math.sqrt(hd)

    def _ln(x, g, b):
        # row-wise LayerNorm over the last dim (eps = 1e-5, PyTorch default)
        mu = jnp.mean(x, axis=-1, keepdims=True)
        var = jnp.mean(jnp.square(x - mu), axis=-1, keepdims=True)
        return (x - mu) * jax.lax.rsqrt(var + 1e-5) * g + b

    def kernel(*refs):
        patch_ref, wpatch_ref, poscls_ref, lnpre_g, lnpre_b = refs[:5]
        idx = 5
        layer_refs = [refs[idx + 12 * i: idx + 12 * (i + 1)]
                      for i in range(num_layers)]
        idx += 12 * num_layers
        lnpost_g, lnpost_b, proj_ref, wfin_ref, bfin_ref = refs[idx: idx + 5]
        o_ref = refs[idx + 5]

        # ---- patch embedding (conv1 as bias-free matmul) -------------------
        # patch_ref block: (1, L, C*p*p); row 0 is zero (class-token slot).
        x = jnp.dot(patch_ref[0], wpatch_ref[...],
                    preferred_element_type=jnp.float32)        # (L, D)
        # class embedding (row 0) + positional embedding, pre-folded in glue.
        x = x + poscls_ref[...]
        x = _ln(x, lnpre_g[...], lnpre_b[...])

        # ---- transformer blocks --------------------------------------------
        for (ln1g, ln1b, wqkv, bqkv, wo, bo,
             ln2g, ln2b, w1, b1, w2, b2) in layer_refs:
            # --- self-attention sub-block ---
            y = _ln(x, ln1g[...], ln1b[...])
            qkv = jnp.dot(y, wqkv[...],
                          preferred_element_type=jnp.float32) + bqkv[...]  # (L, 3D)
            wo_v = wo[...]                                                  # (D, D)
            attn = None
            for h in range(nH):
                qh = qkv[:, h * hd:(h + 1) * hd] * scale                    # (L, hd)
                kh = qkv[:, D + h * hd: D + (h + 1) * hd]                   # (L, hd)
                vh = qkv[:, 2 * D + h * hd: 2 * D + (h + 1) * hd]           # (L, hd)
                s = jax.lax.dot_general(
                    qh, kh, (((1,), (1,)), ((), ())),
                    preferred_element_type=jnp.float32)                     # (L, L)
                m = jnp.max(s, axis=-1, keepdims=True)
                p = jnp.exp(s - m)
                p = p * pl.reciprocal(jnp.sum(p, axis=-1, keepdims=True),
                                      approx=True)
                oh = jnp.dot(p, vh, preferred_element_type=jnp.float32)     # (L, hd)
                # merge heads by accumulating per-head out-projection:
                #   concat(heads) @ Wo == sum_h heads[h] @ Wo[h*hd:(h+1)*hd]
                oh = jnp.dot(oh, wo_v[h * hd:(h + 1) * hd, :],
                             preferred_element_type=jnp.float32)            # (L, D)
                attn = oh if attn is None else attn + oh
            x = x + attn + bo[...]

            # --- MLP sub-block (Linear -> QuickGELU -> Linear) ---
            y = _ln(x, ln2g[...], ln2b[...])
            hdn = jnp.dot(y, w1[...],
                          preferred_element_type=jnp.float32) + b1[...]     # (L, 4D)
            hdn = hdn * jax.nn.sigmoid(1.702 * hdn)
            out = jnp.dot(hdn, w2[...],
                          preferred_element_type=jnp.float32) + b2[...]     # (L, D)
            x = x + out

        # ---- head: ln_post on class token, CLIP proj, final Linear ---------
        cls_tok = _ln(x[0:1, :], lnpost_g[...], lnpost_b[...])              # (1, D)
        feat = jnp.dot(cls_tok, proj_ref[...],
                       preferred_element_type=jnp.float32)                  # (1, clip)
        res = jnp.dot(feat, wfin_ref[...],
                      preferred_element_type=jnp.float32) + bfin_ref[...]   # (1, out)
        o_ref[0] = res

    return kernel


def _resident_spec(arr):
    """Full-array BlockSpec with a constant index_map (stays VMEM-resident)."""
    nd = arr.ndim

    def imap(n):
        return (0,) * nd

    return pl.BlockSpec(arr.shape, imap)


# ------------------------------ parameter init ------------------------------

def init_params(key, cfg):
    C, p, D = cfg["in_ch"], cfg["patch"], cfg["width"]
    P = (cfg["img"] // p) ** 2
    L = P + 1
    clip_dim, out_dim = cfg["clip_dim"], cfg["out_dim"]
    n_layers = cfg["layers"]
    Cpp = C * p * p

    def nrm(k, shape, scale=0.02):
        return scale * jax.random.normal(k, shape, dtype=jnp.float32)

    keys = iter(jax.random.split(key, 8 + 8 * n_layers))

    conv1_w = nrm(next(keys), (D, C, p, p))              # conv2d weight, no bias
    params = {
        # all matmul weights pre-transposed ONCE to (K, N); biases 2-D (1, N)
        "w_patch": conv1_w.reshape(D, Cpp).T,            # (C*p*p, D)
        "class_embedding": nrm(next(keys), (1, D)),
        "positional_embedding": nrm(next(keys), (L, D)),
        "ln_pre_g": jnp.ones((1, D), jnp.float32),
        "ln_pre_b": jnp.zeros((1, D), jnp.float32),
        "ln_post_g": jnp.ones((1, D), jnp.float32),
        "ln_post_b": jnp.zeros((1, D), jnp.float32),
        "proj": nrm(next(keys), (D, clip_dim)),          # x @ proj, no bias
        "final_w": nrm(next(keys), (out_dim, clip_dim)).T,   # stored (clip, out)
        "final_b": jnp.zeros((1, out_dim), jnp.float32),
        "layers": [],
    }
    for _ in range(n_layers):
        in_proj_w = nrm(next(keys), (3 * D, D))          # PyTorch MHA layout
        out_proj_w = nrm(next(keys), (D, D))
        fc1_w = nrm(next(keys), (4 * D, D))
        fc2_w = nrm(next(keys), (D, 4 * D))
        params["layers"].append({
            "ln1_g": jnp.ones((1, D), jnp.float32),
            "ln1_b": jnp.zeros((1, D), jnp.float32),
            "w_qkv": in_proj_w.T,                        # (D, 3D)
            "b_qkv": jnp.zeros((1, 3 * D), jnp.float32),
            "w_out": out_proj_w.T,                       # (D, D)
            "b_out": jnp.zeros((1, D), jnp.float32),
            "ln2_g": jnp.ones((1, D), jnp.float32),
            "ln2_b": jnp.zeros((1, D), jnp.float32),
            "w_fc1": fc1_w.T,                            # (D, 4D)
            "b_fc1": jnp.zeros((1, 4 * D), jnp.float32),
            "w_fc2": fc2_w.T,                            # (4D, D)
            "b_fc2": jnp.zeros((1, D), jnp.float32),
        })
    return params


# --------------------------------- forward ----------------------------------

def custom_clip_v_forward(imgs, params, cfg):
    """imgs: (B, T, C, H, W) float32  ->  (B, T, out_dim)."""
    B, T, C, H, W = imgs.shape
    p = cfg["patch"]
    D = cfg["width"]
    nH = cfg["heads"]
    hd = D // nH
    N = B * T
    gh, gw = H // p, W // p
    P = gh * gw
    L = P + 1
    Cpp = C * p * p
    out_dim = cfg["out_dim"]
    num_layers = cfg["layers"]

    # conv1 (kernel=stride=patch, bias=False) -> im2col; prepend a zero row per
    # frame so the kernel's patch matmul yields 0 in the class-token slot.
    x = imgs.reshape(N, C, gh, p, gw, p)
    patches = x.transpose(0, 2, 4, 1, 3, 5).reshape(N, P, Cpp)
    patches = jnp.pad(patches, ((0, 0), (1, 0), (0, 0)))      # (N, L, Cpp)

    # Fold class_embedding into row 0 of the positional embedding (tiny, once
    # per call): x[0] = 0 + cls + pos[0]; x[i>0] = patch_i @ W + pos[i].
    pos_cls = params["positional_embedding"].at[0].add(params["class_embedding"][0])

    inputs = [patches, params["w_patch"], pos_cls,
              params["ln_pre_g"], params["ln_pre_b"]]
    for lyr in params["layers"]:
        inputs.extend(lyr[k] for k in LAYER_KEYS)
    inputs.extend([params["ln_post_g"], params["ln_post_b"], params["proj"],
                   params["final_w"], params["final_b"]])

    in_specs = [pl.BlockSpec((1, L, Cpp), lambda n: (n, 0, 0))]
    in_specs += [_resident_spec(a) for a in inputs[1:]]

    kernel = _make_clip_kernel(num_layers=num_layers, nH=nH, hd=hd, D=D, L=L)

    out = pl.pallas_call(
        kernel,
        out_shape=jax.ShapeDtypeStruct((N, 1, out_dim), jnp.float32),
        grid=(N,),
        in_specs=in_specs,
        out_specs=pl.BlockSpec((1, 1, out_dim), lambda n: (n, 0, 0)),
        compiler_params=pltpu.CompilerParams(
            dimension_semantics=("parallel",)),
    )(*inputs)

    return out.reshape(B, T, out_dim)


# ----------------------------------- main ------------------------------------

if __name__ == "__main__":
    cfg = dict(
        in_ch=3,      # RGB
        img=16,       # small image resolution
        patch=8,      # -> 2x2 = 4 patches, L = 5 tokens
        width=32,     # transformer width
        heads=4,      # head_dim = 8
        layers=2,     # transformer depth
        clip_dim=64,  # stands in for CLIP's 512-d visual embedding
        out_dim=128,  # stands in for out_dim=1024 of self.final_layer
    )
    B, T = 2, 2

    root = jax.random.PRNGKey(0)
    k_img, k_par = jax.random.split(root)
    imgs = jax.random.normal(
        k_img, (B, T, cfg["in_ch"], cfg["img"], cfg["img"]), dtype=jnp.float32)
    params = init_params(k_par, cfg)

    fwd = jax.jit(functools.partial(custom_clip_v_forward, cfg=cfg))
    out = fwd(imgs, params)
    out = jax.block_until_ready(out)

    assert out.shape == (B, T, cfg["out_dim"]), out.shape
    assert jnp.all(jnp.isfinite(out))
    print("KERNEL_OK")
</pallas_src>

<mosaic_0001>
module attributes {stable_mosaic.version = 11 : i64} {
  func.func @kernel(%arg0: i32, %arg1: memref<1x5x192xf32, #tpu.memory_space<vmem>>, %arg2: memref<192x32xf32, #tpu.memory_space<vmem>>, %arg3: memref<5x32xf32, #tpu.memory_space<vmem>>, %arg4: memref<1x32xf32, #tpu.memory_space<vmem>>, %arg5: memref<1x32xf32, #tpu.memory_space<vmem>>, %arg6: memref<1x32xf32, #tpu.memory_space<vmem>>, %arg7: memref<1x32xf32, #tpu.memory_space<vmem>>, %arg8: memref<32x96xf32, #tpu.memory_space<vmem>>, %arg9: memref<1x96xf32, #tpu.memory_space<vmem>>, %arg10: memref<32x32xf32, #tpu.memory_space<vmem>>, %arg11: memref<1x32xf32, #tpu.memory_space<vmem>>, %arg12: memref<1x32xf32, #tpu.memory_space<vmem>>, %arg13: memref<1x32xf32, #tpu.memory_space<vmem>>, %arg14: memref<32x128xf32, #tpu.memory_space<vmem>>, %arg15: memref<1x128xf32, #tpu.memory_space<vmem>>, %arg16: memref<128x32xf32, #tpu.memory_space<vmem>>, %arg17: memref<1x32xf32, #tpu.memory_space<vmem>>, %arg18: memref<1x32xf32, #tpu.memory_space<vmem>>, %arg19: memref<1x32xf32, #tpu.memory_space<vmem>>, %arg20: memref<32x96xf32, #tpu.memory_space<vmem>>, %arg21: memref<1x96xf32, #tpu.memory_space<vmem>>, %arg22: memref<32x32xf32, #tpu.memory_space<vmem>>, %arg23: memref<1x32xf32, #tpu.memory_space<vmem>>, %arg24: memref<1x32xf32, #tpu.memory_space<vmem>>, %arg25: memref<1x32xf32, #tpu.memory_space<vmem>>, %arg26: memref<32x128xf32, #tpu.memory_space<vmem>>, %arg27: memref<1x128xf32, #tpu.memory_space<vmem>>, %arg28: memref<128x32xf32, #tpu.memory_space<vmem>>, %arg29: memref<1x32xf32, #tpu.memory_space<vmem>>, %arg30: memref<1x32xf32, #tpu.memory_space<vmem>>, %arg31: memref<1x32xf32, #tpu.memory_space<vmem>>, %arg32: memref<32x64xf32, #tpu.memory_space<vmem>>, %arg33: memref<64x128xf32, #tpu.memory_space<vmem>>, %arg34: memref<1x128xf32, #tpu.memory_space<vmem>>, %arg35: memref<1x1x128xf32, #tpu.memory_space<vmem>>) attributes {dimension_semantics = [#tpu.dimension_semantics<parallel>], iteration_bounds = array<i64: 4>, scalar_prefetch = 0 : i64, scratch_operands = 0 : i64, tpu.core_type = #tpu.core_type<tc>, window_params = [{transform_indices = @transform_0, window_bounds = array<i64: 1, 5, 192>}, {pipeline_mode = #tpu.pipeline_mode<synchronous>, transform_indices = @transform_1, window_bounds = array<i64: 192, 32>}, {pipeline_mode = #tpu.pipeline_mode<synchronous>, transform_indices = @transform_2, window_bounds = array<i64: 5, 32>}, {pipeline_mode = #tpu.pipeline_mode<synchronous>, transform_indices = @transform_3, window_bounds = array<i64: 1, 32>}, {pipeline_mode = #tpu.pipeline_mode<synchronous>, transform_indices = @transform_4, window_bounds = array<i64: 1, 32>}, {pipeline_mode = #tpu.pipeline_mode<synchronous>, transform_indices = @transform_5, window_bounds = array<i64: 1, 32>}, {pipeline_mode = #tpu.pipeline_mode<synchronous>, transform_indices = @transform_6, window_bounds = array<i64: 1, 32>}, {pipeline_mode = #tpu.pipeline_mode<synchronous>, transform_indices = @transform_7, window_bounds = array<i64: 32, 96>}, {pipeline_mode = #tpu.pipeline_mode<synchronous>, transform_indices = @transform_8, window_bounds = array<i64: 1, 96>}, {pipeline_mode = #tpu.pipeline_mode<synchronous>, transform_indices = @transform_9, window_bounds = array<i64: 32, 32>}, {pipeline_mode = #tpu.pipeline_mode<synchronous>, transform_indices = @transform_10, window_bounds = array<i64: 1, 32>}, {pipeline_mode = #tpu.pipeline_mode<synchronous>, transform_indices = @transform_11, window_bounds = array<i64: 1, 32>}, {pipeline_mode = #tpu.pipeline_mode<synchronous>, transform_indices = @transform_12, window_bounds = array<i64: 1, 32>}, {pipeline_mode = #tpu.pipeline_mode<synchronous>, transform_indices = @transform_13, window_bounds = array<i64: 32, 128>}, {pipeline_mode = #tpu.pipeline_mode<synchronous>, transform_indices = @transform_14, window_bounds = array<i64: 1, 128>}, {pipeline_mode = #tpu.pipeline_mode<synchronous>, transform_indices = @transform_15, window_bounds = array<i64: 128, 32>}, {pipeline_mode = #tpu.pipeline_mode<synchronous>, transform_indices = @transform_16, window_bounds = array<i64: 1, 32>}, {pipeline_mode = #tpu.pipeline_mode<synchronous>, transform_indices = @transform_17, window_bounds = array<i64: 1, 32>}, {pipeline_mode = #tpu.pipeline_mode<synchronous>, transform_indices = @transform_18, window_bounds = array<i64: 1, 32>}, {pipeline_mode = #tpu.pipeline_mode<synchronous>, transform_indices = @transform_19, window_bounds = array<i64: 32, 96>}, {pipeline_mode = #tpu.pipeline_mode<synchronous>, transform_indices = @transform_20, window_bounds = array<i64: 1, 96>}, {pipeline_mode = #tpu.pipeline_mode<synchronous>, transform_indices = @transform_21, window_bounds = array<i64: 32, 32>}, {pipeline_mode = #tpu.pipeline_mode<synchronous>, transform_indices = @transform_22, window_bounds = array<i64: 1, 32>}, {pipeline_mode = #tpu.pipeline_mode<synchronous>, transform_indices = @transform_23, window_bounds = array<i64: 1, 32>}, {pipeline_mode = #tpu.pipeline_mode<synchronous>, transform_indices = @transform_24, window_bounds = array<i64: 1, 32>}, {pipeline_mode = #tpu.pipeline_mode<synchronous>, transform_indices = @transform_25, window_bounds = array<i64: 32, 128>}, {pipeline_mode = #tpu.pipeline_mode<synchronous>, transform_indices = @transform_26, window_bounds = array<i64: 1, 128>}, {pipeline_mode = #tpu.pipeline_mode<synchronous>, transform_indices = @transform_27, window_bounds = array<i64: 128, 32>}, {pipeline_mode = #tpu.pipeline_mode<synchronous>, transform_indices = @transform_28, window_bounds = array<i64: 1, 32>}, {pipeline_mode = #tpu.pipeline_mode<synchronous>, transform_indices = @transform_29, window_bounds = array<i64: 1, 32>}, {pipeline_mode = #tpu.pipeline_mode<synchronous>, transform_indices = @transform_30, window_bounds = array<i64: 1, 32>}, {pipeline_mode = #tpu.pipeline_mode<synchronous>, transform_indices = @transform_31, window_bounds = array<i64: 32, 64>}, {pipeline_mode = #tpu.pipeline_mode<synchronous>, transform_indices = @transform_32, window_bounds = array<i64: 64, 128>}, {pipeline_mode = #tpu.pipeline_mode<synchronous>, transform_indices = @transform_33, window_bounds = array<i64: 1, 128>}, {transform_indices = @transform_34, window_bounds = array<i64: 1, 1, 128>}]} {
    %c0 = arith.constant 0 : index
    %c0_0 = arith.constant 0 : index
    %c0_1 = arith.constant 0 : index
    %0 = vector.load %arg1[%c0, %c0_0, %c0_1] : memref<1x5x192xf32, #tpu.memory_space<vmem>>, vector<1x5x192xf32>
    %1 = vector.shape_cast %0 : vector<1x5x192xf32> to vector<5x192xf32>
    %c0_2 = arith.constant 0 : index
    %c0_3 = arith.constant 0 : index
    %2 = vector.load %arg2[%c0_2, %c0_3] : memref<192x32xf32, #tpu.memory_space<vmem>>, vector<192x32xf32>
    %cst = arith.constant dense<0.000000e+00> : vector<5x32xf32>
    %3 = tpu.matmul %1, %2, %cst {dimension_numbers = #tpu.dot_dimension_numbers<[1], [0], [0], [1], [0, 0, 1, 1], [], []>} : vector<5x192xf32>, vector<192x32xf32>, vector<5x32xf32> -> vector<5x32xf32>
    %c0_4 = arith.constant 0 : index
    %c0_5 = arith.constant 0 : index
    %4 = vector.load %arg3[%c0_4, %c0_5] : memref<5x32xf32, #tpu.memory_space<vmem>>, vector<5x32xf32>
    %5 = arith.addf %3, %4 : vector<5x32xf32>
    %c0_6 = arith.constant 0 : index
    %c0_7 = arith.constant 0 : index
    %6 = vector.load %arg4[%c0_6, %c0_7] : memref<1x32xf32, #tpu.memory_space<vmem>>, vector<1x32xf32>
    %c0_8 = arith.constant 0 : index
    %c0_9 = arith.constant 0 : index
    %7 = vector.load %arg5[%c0_8, %c0_9] : memref<1x32xf32, #tpu.memory_space<vmem>>, vector<1x32xf32>
    %cst_10 = arith.constant dense<0.000000e+00> : vector<5xf32>
    %8 = vector.multi_reduction <add>, %5, %cst_10 [1] : vector<5x32xf32> to vector<5xf32>
    %9 = vector.shape_cast %8 : vector<5xf32> to vector<5x1xf32>
    %cst_11 = arith.constant 3.200000e+01 : f32
    %10 = vector.broadcast %cst_11 : f32 to vector<5x1xf32>
    %11 = arith.divf %9, %10 : vector<5x1xf32>
    %12 = vector.broadcast %11 : vector<5x1xf32> to vector<5x32xf32>
    %13 = arith.subf %5, %12 : vector<5x32xf32>
    %14 = arith.mulf %13, %13 : vector<5x32xf32>
    %cst_12 = arith.constant dense<0.000000e+00> : vector<5xf32>
    %15 = vector.multi_reduction <add>, %14, %cst_12 [1] : vector<5x32xf32> to vector<5xf32>
    %16 = vector.shape_cast %15 : vector<5xf32> to vector<5x1xf32>
    %cst_13 = arith.constant 3.200000e+01 : f32
    %17 = vector.broadcast %cst_13 : f32 to vector<5x1xf32>
    %18 = arith.divf %16, %17 : vector<5x1xf32>
    %19 = vector.broadcast %11 : vector<5x1xf32> to vector<5x32xf32>
    %20 = arith.subf %5, %19 : vector<5x32xf32>
    %cst_14 = arith.constant 9.99999974E-6 : f32
    %21 = vector.broadcast %cst_14 : f32 to vector<5x1xf32>
    %22 = arith.addf %18, %21 : vector<5x1xf32>
    %23 = math.rsqrt %22 : vector<5x1xf32>
    %24 = vector.broadcast %23 : vector<5x1xf32> to vector<5x32xf32>
    %25 = arith.mulf %20, %24 : vector<5x32xf32>
    %26 = vector.broadcast %6 : vector<1x32xf32> to vector<5x32xf32>
    %27 = arith.mulf %25, %26 : vector<5x32xf32>
    %28 = vector.broadcast %7 : vector<1x32xf32> to vector<5x32xf32>
    %29 = arith.addf %27, %28 : vector<5x32xf32>
    %c0_15 = arith.constant 0 : index
    %c0_16 = arith.constant 0 : index
    %30 = vector.load %arg6[%c0_15, %c0_16] : memref<1x32xf32, #tpu.memory_space<vmem>>, vector<1x32xf32>
    %c0_17 = arith.constant 0 : index
    %c0_18 = arith.constant 0 : index
    %31 = vector.load %arg7[%c0_17, %c0_18] : memref<1x32xf32, #tpu.memory_space<vmem>>, vector<1x32xf32>
    %cst_19 = arith.constant dense<0.000000e+00> : vector<5xf32>
    %32 = vector.multi_reduction <add>, %29, %cst_19 [1] : vector<5x32xf32> to vector<5xf32>
    %33 = vector.shape_cast %32 : vector<5xf32> to vector<5x1xf32>
    %cst_20 = arith.constant 3.200000e+01 : f32
    %34 = vector.broadcast %cst_20 : f32 to vector<5x1xf32>
    %35 = arith.divf %33, %34 : vector<5x1xf32>
    %36 = vector.broadcast %35 : vector<5x1xf32> to vector<5x32xf32>
    %37 = arith.subf %29, %36 : vector<5x32xf32>
    %38 = arith.mulf %37, %37 : vector<5x32xf32>
    %cst_21 = arith.constant dense<0.000000e+00> : vector<5xf32>
    %39 = vector.multi_reduction <add>, %38, %cst_21 [1] : vector<5x32xf32> to vector<5xf32>
    %40 = vector.shape_cast %39 : vector<5xf32> to vector<5x1xf32>
    %cst_22 = arith.constant 3.200000e+01 : f32
    %41 = vector.broadcast %cst_22 : f32 to vector<5x1xf32>
    %42 = arith.divf %40, %41 : vector<5x1xf32>
    %43 = vector.broadcast %35 : vector<5x1xf32> to vector<5x32xf32>
    %44 = arith.subf %29, %43 : vector<5x32xf32>
    %cst_23 = arith.constant 9.99999974E-6 : f32
    %45 = vector.broadcast %cst_23 : f32 to vector<5x1xf32>
    %46 = arith.addf %42, %45 : vector<5x1xf32>
    %47 = math.rsqrt %46 : vector<5x1xf32>
    %48 = vector.broadcast %47 : vector<5x1xf32> to vector<5x32xf32>
    %49 = arith.mulf %44, %48 : vector<5x32xf32>
    %50 = vector.broadcast %30 : vector<1x32xf32> to vector<5x32xf32>
    %51 = arith.mulf %49, %50 : vector<5x32xf32>
    %52 = vector.broadcast %31 : vector<1x32xf32> to vector<5x32xf32>
    %53 = arith.addf %51, %52 : vector<5x32xf32>
    %c0_24 = arith.constant 0 : index
    %c0_25 = arith.constant 0 : index
    %54 = vector.load %arg8[%c0_24, %c0_25] : memref<32x96xf32, #tpu.memory_space<vmem>>, vector<32x96xf32>
    %cst_26 = arith.constant dense<0.000000e+00> : vector<5x96xf32>
    %55 = tpu.matmul %53, %54, %cst_26 {dimension_numbers = #tpu.dot_dimension_numbers<[1], [0], [0], [1], [0, 0, 1, 1], [], []>} : vector<5x32xf32>, vector<32x96xf32>, vector<5x96xf32> -> vector<5x96xf32>
    %c0_27 = arith.constant 0 : index
    %c0_28 = arith.constant 0 : index
    %56 = vector.load %arg9[%c0_27, %c0_28] : memref<1x96xf32, #tpu.memory_space<vmem>>, vector<1x96xf32>
    %57 = vector.broadcast %56 : vector<1x96xf32> to vector<5x96xf32>
    %58 = arith.addf %55, %57 : vector<5x96xf32>
    %c0_29 = arith.constant 0 : index
    %c0_30 = arith.constant 0 : index
    %59 = vector.load %arg10[%c0_29, %c0_30] : memref<32x32xf32, #tpu.memory_space<vmem>>, vector<32x32xf32>
    %60 = vector.extract_strided_slice %58 {offsets = [0, 0], sizes = [5, 8], strides = [1, 1]} : vector<5x96xf32> to vector<5x8xf32>
    %cst_31 = arith.constant 0.353553385 : f32
    %61 = vector.broadcast %cst_31 : f32 to vector<5x8xf32>
    %62 = arith.mulf %60, %61 : vector<5x8xf32>
    %63 = vector.extract_strided_slice %58 {offsets = [0, 32], sizes = [5, 8], strides = [1, 1]} : vector<5x96xf32> to vector<5x8xf32>
    %64 = vector.extract_strided_slice %58 {offsets = [0, 64], sizes = [5, 8], strides = [1, 1]} : vector<5x96xf32> to vector<5x8xf32>
    %cst_32 = arith.constant dense<0.000000e+00> : vector<5x5xf32>
    %65 = tpu.matmul %62, %63, %cst_32 {dimension_numbers = #tpu.dot_dimension_numbers<[1], [1], [0], [0], [0, 0, 1, 0], [], []>} : vector<5x8xf32>, vector<5x8xf32>, vector<5x5xf32> -> vector<5x5xf32>
    %cst_33 = arith.constant dense<0xFF800000> : vector<5xf32>
    %66 = vector.multi_reduction <maximumf>, %65, %cst_33 [1] : vector<5x5xf32> to vector<5xf32>
    %67 = vector.shape_cast %66 : vector<5xf32> to vector<5x1xf32>
    %68 = vector.broadcast %67 : vector<5x1xf32> to vector<5x5xf32>
    %69 = arith.subf %65, %68 : vector<5x5xf32>
    %70 = math.exp %69 : vector<5x5xf32>
    %cst_34 = arith.constant dense<0.000000e+00> : vector<5xf32>
    %71 = vector.multi_reduction <add>, %70, %cst_34 [1] : vector<5x5xf32> to vector<5xf32>
    %72 = vector.shape_cast %71 : vector<5xf32> to vector<5x1xf32>
    %73 = tpu.reciprocal %72 {approx = true} : vector<5x1xf32> -> vector<5x1xf32>
    %74 = vector.broadcast %73 : vector<5x1xf32> to vector<5x5xf32>
    %75 = arith.mulf %70, %74 : vector<5x5xf32>
    %cst_35 = arith.constant dense<0.000000e+00> : vector<5x8xf32>
    %76 = tpu.matmul %75, %64, %cst_35 {dimension_numbers = #tpu.dot_dimension_numbers<[1], [0], [0], [1], [0, 0, 1, 1], [], []>} : vector<5x5xf32>, vector<5x8xf32>, vector<5x8xf32> -> vector<5x8xf32>
    %77 = vector.extract_strided_slice %59 {offsets = [0, 0], sizes = [8, 32], strides = [1, 1]} : vector<32x32xf32> to vector<8x32xf32>
    %cst_36 = arith.constant dense<0.000000e+00> : vector<5x32xf32>
    %78 = tpu.matmul %76, %77, %cst_36 {dimension_numbers = #tpu.dot_dimension_numbers<[1], [0], [0], [1], [0, 0, 1, 1], [], []>} : vector<5x8xf32>, vector<8x32xf32>, vector<5x32xf32> -> vector<5x32xf32>
    %79 = vector.extract_strided_slice %58 {offsets = [0, 8], sizes = [5, 8], strides = [1, 1]} : vector<5x96xf32> to vector<5x8xf32>
    %cst_37 = arith.constant 0.353553385 : f32
    %80 = vector.broadcast %cst_37 : f32 to vector<5x8xf32>
    %81 = arith.mulf %79, %80 : vector<5x8xf32>
    %82 = vector.extract_strided_slice %58 {offsets = [0, 40], sizes = [5, 8], strides = [1, 1]} : vector<5x96xf32> to vector<5x8xf32>
    %83 = vector.extract_strided_slice %58 {offsets = [0, 72], sizes = [5, 8], strides = [1, 1]} : vector<5x96xf32> to vector<5x8xf32>
    %cst_38 = arith.constant dense<0.000000e+00> : vector<5x5xf32>
    %84 = tpu.matmul %81, %82, %cst_38 {dimension_numbers = #tpu.dot_dimension_numbers<[1], [1], [0], [0], [0, 0, 1, 0], [], []>} : vector<5x8xf32>, vector<5x8xf32>, vector<5x5xf32> -> vector<5x5xf32>
    %cst_39 = arith.constant dense<0xFF800000> : vector<5xf32>
    %85 = vector.multi_reduction <maximumf>, %84, %cst_39 [1] : vector<5x5xf32> to vector<5xf32>
    %86 = vector.shape_cast %85 : vector<5xf32> to vector<5x1xf32>
    %87 = vector.broadcast %86 : vector<5x1xf32> to vector<5x5xf32>
    %88 = arith.subf %84, %87 : vector<5x5xf32>
    %89 = math.exp %88 : vector<5x5xf32>
    %cst_40 = arith.constant dense<0.000000e+00> : vector<5xf32>
    %90 = vector.multi_reduction <add>, %89, %cst_40 [1] : vector<5x5xf32> to vector<5xf32>
    %91 = vector.shape_cast %90 : vector<5xf32> to vector<5x1xf32>
    %92 = tpu.reciprocal %91 {approx = true} : vector<5x1xf32> -> vector<5x1xf32>
    %93 = vector.broadcast %92 : vector<5x1xf32> to vector<5x5xf32>
    %94 = arith.mulf %89, %93 : vector<5x5xf32>
    %cst_41 = arith.constant dense<0.000000e+00> : vector<5x8xf32>
    %95 = tpu.matmul %94, %83, %cst_41 {dimension_numbers = #tpu.dot_dimension_numbers<[1], [0], [0], [1], [0, 0, 1, 1], [], []>} : vector<5x5xf32>, vector<5x8xf32>, vector<5x8xf32> -> vector<5x8xf32>
    %96 = vector.extract_strided_slice %59 {offsets = [8, 0], sizes = [8, 32], strides = [1, 1]} : vector<32x32xf32> to vector<8x32xf32>
    %cst_42 = arith.constant dense<0.000000e+00> : vector<5x32xf32>
    %97 = tpu.matmul %95, %96, %cst_42 {dimension_numbers = #tpu.dot_dimension_numbers<[1], [0], [0], [1], [0, 0, 1, 1], [], []>} : vector<5x8xf32>, vector<8x32xf32>, vector<5x32xf32> -> vector<5x32xf32>
    %98 = arith.addf %78, %97 : vector<5x32xf32>
    %99 = vector.extract_strided_slice %58 {offsets = [0, 16], sizes = [5, 8], strides = [1, 1]} : vector<5x96xf32> to vector<5x8xf32>
    %cst_43 = arith.constant 0.353553385 : f32
    %100 = vector.broadcast %cst_43 : f32 to vector<5x8xf32>
    %101 = arith.mulf %99, %100 : vector<5x8xf32>
    %102 = vector.extract_strided_slice %58 {offsets = [0, 48], sizes = [5, 8], strides = [1, 1]} : vector<5x96xf32> to vector<5x8xf32>
    %103 = vector.extract_strided_slice %58 {offsets = [0, 80], sizes = [5, 8], strides = [1, 1]} : vector<5x96xf32> to vector<5x8xf32>
    %cst_44 = arith.constant dense<0.000000e+00> : vector<5x5xf32>
    %104 = tpu.matmul %101, %102, %cst_44 {dimension_numbers = #tpu.dot_dimension_numbers<[1], [1], [0], [0], [0, 0, 1, 0], [], []>} : vector<5x8xf32>, vector<5x8xf32>, vector<5x5xf32> -> vector<5x5xf32>
    %cst_45 = arith.constant dense<0xFF800000> : vector<5xf32>
    %105 = vector.multi_reduction <maximumf>, %104, %cst_45 [1] : vector<5x5xf32> to vector<5xf32>
    %106 = vector.shape_cast %105 : vector<5xf32> to vector<5x1xf32>
    %107 = vector.broadcast %106 : vector<5x1xf32> to vector<5x5xf32>
    %108 = arith.subf %104, %107 : vector<5x5xf32>
    %109 = math.exp %108 : vector<5x5xf32>
    %cst_46 = arith.constant dense<0.000000e+00> : vector<5xf32>
    %110 = vector.multi_reduction <add>, %109, %cst_46 [1] : vector<5x5xf32> to vector<5xf32>
    %111 = vector.shape_cast %110 : vector<5xf32> to vector<5x1xf32>
    %112 = tpu.reciprocal %111 {approx = true} : vector<5x1xf32> -> vector<5x1xf32>
    %113 = vector.broadcast %112 : vector<5x1xf32> to vector<5x5xf32>
    %114 = arith.mulf %109, %113 : vector<5x5xf32>
    %cst_47 = arith.constant dense<0.000000e+00> : vector<5x8xf32>
    %115 = tpu.matmul %114, %103, %cst_47 {dimension_numbers = #tpu.dot_dimension_numbers<[1], [0], [0], [1], [0, 0, 1, 1], [], []>} : vector<5x5xf32>, vector<5x8xf32>, vector<5x8xf32> -> vector<5x8xf32>
    %116 = vector.extract_strided_slice %59 {offsets = [16, 0], sizes = [8, 32], strides = [1, 1]} : vector<32x32xf32> to vector<8x32xf32>
    %cst_48 = arith.constant dense<0.000000e+00> : vector<5x32xf32>
    %117 = tpu.matmul %115, %116, %cst_48 {dimension_numbers = #tpu.dot_dimension_numbers<[1], [0], [0], [1], [0, 0, 1, 1], [], []>} : vector<5x8xf32>, vector<8x32xf32>, vector<5x32xf32> -> vector<5x32xf32>
    %118 = arith.addf %98, %117 : vector<5x32xf32>
    %119 = vector.extract_strided_slice %58 {offsets = [0, 24], sizes = [5, 8], strides = [1, 1]} : vector<5x96xf32> to vector<5x8xf32>
    %cst_49 = arith.constant 0.353553385 : f32
    %120 = vector.broadcast %cst_49 : f32 to vector<5x8xf32>
    %121 = arith.mulf %119, %120 : vector<5x8xf32>
    %122 = vector.extract_strided_slice %58 {offsets = [0, 56], sizes = [5, 8], strides = [1, 1]} : vector<5x96xf32> to vector<5x8xf32>
    %123 = vector.extract_strided_slice %58 {offsets = [0, 88], sizes = [5, 8], strides = [1, 1]} : vector<5x96xf32> to vector<5x8xf32>
    %cst_50 = arith.constant dense<0.000000e+00> : vector<5x5xf32>
    %124 = tpu.matmul %121, %122, %cst_50 {dimension_numbers = #tpu.dot_dimension_numbers<[1], [1], [0], [0], [0, 0, 1, 0], [], []>} : vector<5x8xf32>, vector<5x8xf32>, vector<5x5xf32> -> vector<5x5xf32>
    %cst_51 = arith.constant dense<0xFF800000> : vector<5xf32>
    %125 = vector.multi_reduction <maximumf>, %124, %cst_51 [1] : vector<5x5xf32> to vector<5xf32>
    %126 = vector.shape_cast %125 : vector<5xf32> to vector<5x1xf32>
    %127 = vector.broadcast %126 : vector<5x1xf32> to vector<5x5xf32>
    %128 = arith.subf %124, %127 : vector<5x5xf32>
    %129 = math.exp %128 : vector<5x5xf32>
    %cst_52 = arith.constant dense<0.000000e+00> : vector<5xf32>
    %130 = vector.multi_reduction <add>, %129, %cst_52 [1] : vector<5x5xf32> to vector<5xf32>
    %131 = vector.shape_cast %130 : vector<5xf32> to vector<5x1xf32>
    %132 = tpu.reciprocal %131 {approx = true} : vector<5x1xf32> -> vector<5x1xf32>
    %133 = vector.broadcast %132 : vector<5x1xf32> to vector<5x5xf32>
    %134 = arith.mulf %129, %133 : vector<5x5xf32>
    %cst_53 = arith.constant dense<0.000000e+00> : vector<5x8xf32>
    %135 = tpu.matmul %134, %123, %cst_53 {dimension_numbers = #tpu.dot_dimension_numbers<[1], [0], [0], [1], [0, 0, 1, 1], [], []>} : vector<5x5xf32>, vector<5x8xf32>, vector<5x8xf32> -> vector<5x8xf32>
    %136 = vector.extract_strided_slice %59 {offsets = [24, 0], sizes = [8, 32], strides = [1, 1]} : vector<32x32xf32> to vector<8x32xf32>
    %cst_54 = arith.constant dense<0.000000e+00> : vector<5x32xf32>
    %137 = tpu.matmul %135, %136, %cst_54 {dimension_numbers = #tpu.dot_dimension_numbers<[1], [0], [0], [1], [0, 0, 1, 1], [], []>} : vector<5x8xf32>, vector<8x32xf32>, vector<5x32xf32> -> vector<5x32xf32>
    %138 = arith.addf %118, %137 : vector<5x32xf32>
    %139 = arith.addf %29, %138 : vector<5x32xf32>
    %c0_55 = arith.constant 0 : index
    %c0_56 = arith.constant 0 : index
    %140 = vector.load %arg11[%c0_55, %c0_56] : memref<1x32xf32, #tpu.memory_space<vmem>>, vector<1x32xf32>
    %141 = vector.broadcast %140 : vector<1x32xf32> to vector<5x32xf32>
    %142 = arith.addf %139, %141 : vector<5x32xf32>
    %c0_57 = arith.constant 0 : index
    %c0_58 = arith.constant 0 : index
    %143 = vector.load %arg12[%c0_57, %c0_58] : memref<1x32xf32, #tpu.memory_space<vmem>>, vector<1x32xf32>
    %c0_59 = arith.constant 0 : index
    %c0_60 = arith.constant 0 : index
    %144 = vector.load %arg13[%c0_59, %c0_60] : memref<1x32xf32, #tpu.memory_space<vmem>>, vector<1x32xf32>
    %cst_61 = arith.constant dense<0.000000e+00> : vector<5xf32>
    %145 = vector.multi_reduction <add>, %142, %cst_61 [1] : vector<5x32xf32> to vector<5xf32>
    %146 = vector.shape_cast %145 : vector<5xf32> to vector<5x1xf32>
    %cst_62 = arith.constant 3.200000e+01 : f32
    %147 = vector.broadcast %cst_62 : f32 to vector<5x1xf32>
    %148 = arith.divf %146, %147 : vector<5x1xf32>
    %149 = vector.broadcast %148 : vector<5x1xf32> to vector<5x32xf32>
    %150 = arith.subf %142, %149 : vector<5x32xf32>
    %151 = arith.mulf %150, %150 : vector<5x32xf32>
    %cst_63 = arith.constant dense<0.000000e+00> : vector<5xf32>
    %152 = vector.multi_reduction <add>, %151, %cst_63 [1] : vector<5x32xf32> to vector<5xf32>
    %153 = vector.shape_cast %152 : vector<5xf32> to vector<5x1xf32>
    %cst_64 = arith.constant 3.200000e+01 : f32
    %154 = vector.broadcast %cst_64 : f32 to vector<5x1xf32>
    %155 = arith.divf %153, %154 : vector<5x1xf32>
    %156 = vector.broadcast %148 : vector<5x1xf32> to vector<5x32xf32>
    %157 = arith.subf %142, %156 : vector<5x32xf32>
    %cst_65 = arith.constant 9.99999974E-6 : f32
    %158 = vector.broadcast %cst_65 : f32 to vector<5x1xf32>
    %159 = arith.addf %155, %158 : vector<5x1xf32>
    %160 = math.rsqrt %159 : vector<5x1xf32>
    %161 = vector.broadcast %160 : vector<5x1xf32> to vector<5x32xf32>
    %162 = arith.mulf %157, %161 : vector<5x32xf32>
    %163 = vector.broadcast %143 : vector<1x32xf32> to vector<5x32xf32>
    %164 = arith.mulf %162, %163 : vector<5x32xf32>
    %165 = vector.broadcast %144 : vector<1x32xf32> to vector<5x32xf32>
    %166 = arith.addf %164, %165 : vector<5x32xf32>
    %c0_66 = arith.constant 0 : index
    %c0_67 = arith.constant 0 : index
    %167 = vector.load %arg14[%c0_66, %c0_67] : memref<32x128xf32, #tpu.memory_space<vmem>>, vector<32x128xf32>
    %cst_68 = arith.constant dense<0.000000e+00> : vector<5x128xf32>
    %168 = tpu.matmul %166, %167, %cst_68 {dimension_numbers = #tpu.dot_dimension_numbers<[1], [0], [0], [1], [0, 0, 1, 1], [], []>} : vector<5x32xf32>, vector<32x128xf32>, vector<5x128xf32> -> vector<5x128xf32>
    %c0_69 = arith.constant 0 : index
    %c0_70 = arith.constant 0 : index
    %169 = vector.load %arg15[%c0_69, %c0_70] : memref<1x128xf32, #tpu.memory_space<vmem>>, vector<1x128xf32>
    %170 = vector.broadcast %169 : vector<1x128xf32> to vector<5x128xf32>
    %171 = arith.addf %168, %170 : vector<5x128xf32>
    %cst_71 = arith.constant 1.702000e+00 : f32
    %172 = vector.broadcast %cst_71 : f32 to vector<5x128xf32>
    %173 = arith.mulf %172, %171 : vector<5x128xf32>
    %174 = arith.negf %173 : vector<5x128xf32>
    %175 = math.exp %174 : vector<5x128xf32>
    %cst_72 = arith.constant 1.000000e+00 : f32
    %176 = vector.broadcast %cst_72 : f32 to vector<5x128xf32>
    %177 = arith.addf %176, %175 : vector<5x128xf32>
    %178 = arith.divf %176, %177 : vector<5x128xf32>
    %179 = arith.mulf %171, %178 : vector<5x128xf32>
    %c0_73 = arith.constant 0 : index
    %c0_74 = arith.constant 0 : index
    %180 = vector.load %arg16[%c0_73, %c0_74] : memref<128x32xf32, #tpu.memory_space<vmem>>, vector<128x32xf32>
    %cst_75 = arith.constant dense<0.000000e+00> : vector<5x32xf32>
    %181 = tpu.matmul %179, %180, %cst_75 {dimension_numbers = #tpu.dot_dimension_numbers<[1], [0], [0], [1], [0, 0, 1, 1], [], []>} : vector<5x128xf32>, vector<128x32xf32>, vector<5x32xf32> -> vector<5x32xf32>
    %c0_76 = arith.constant 0 : index
    %c0_77 = arith.constant 0 : index
    %182 = vector.load %arg17[%c0_76, %c0_77] : memref<1x32xf32, #tpu.memory_space<vmem>>, vector<1x32xf32>
    %183 = vector.broadcast %182 : vector<1x32xf32> to vector<5x32xf32>
    %184 = arith.addf %181, %183 : vector<5x32xf32>
    %185 = arith.addf %142, %184 : vector<5x32xf32>
    %c0_78 = arith.constant 0 : index
    %c0_79 = arith.constant 0 : index
    %186 = vector.load %arg18[%c0_78, %c0_79] : memref<1x32xf32, #tpu.memory_space<vmem>>, vector<1x32xf32>
    %c0_80 = arith.constant 0 : index
    %c0_81 = arith.constant 0 : index
    %187 = vector.load %arg19[%c0_80, %c0_81] : memref<1x32xf32, #tpu.memory_space<vmem>>, vector<1x32xf32>
    %cst_82 = arith.constant dense<0.000000e+00> : vector<5xf32>
    %188 = vector.multi_reduction <add>, %185, %cst_82 [1] : vector<5x32xf32> to vector<5xf32>
    %189 = vector.shape_cast %188 : vector<5xf32> to vector<5x1xf32>
    %cst_83 = arith.constant 3.200000e+01 : f32
    %190 = vector.broadcast %cst_83 : f32 to vector<5x1xf32>
    %191 = arith.divf %189, %190 : vector<5x1xf32>
    %192 = vector.broadcast %191 : vector<5x1xf32> to vector<5x32xf32>
    %193 = arith.subf %185, %192 : vector<5x32xf32>
    %194 = arith.mulf %193, %193 : vector<5x32xf32>
    %cst_84 = arith.constant dense<0.000000e+00> : vector<5xf32>
    %195 = vector.multi_reduction <add>, %194, %cst_84 [1] : vector<5x32xf32> to vector<5xf32>
    %196 = vector.shape_cast %195 : vector<5xf32> to vector<5x1xf32>
    %cst_85 = arith.constant 3.200000e+01 : f32
    %197 = vector.broadcast %cst_85 : f32 to vector<5x1xf32>
    %198 = arith.divf %196, %197 : vector<5x1xf32>
    %199 = vector.broadcast %191 : vector<5x1xf32> to vector<5x32xf32>
    %200 = arith.subf %185, %199 : vector<5x32xf32>
    %cst_86 = arith.constant 9.99999974E-6 : f32
    %201 = vector.broadcast %cst_86 : f32 to vector<5x1xf32>
    %202 = arith.addf %198, %201 : vector<5x1xf32>
    %203 = math.rsqrt %202 : vector<5x1xf32>
    %204 = vector.broadcast %203 : vector<5x1xf32> to vector<5x32xf32>
    %205 = arith.mulf %200, %204 : vector<5x32xf32>
    %206 = vector.broadcast %186 : vector<1x32xf32> to vector<5x32xf32>
    %207 = arith.mulf %205, %206 : vector<5x32xf32>
    %208 = vector.broadcast %187 : vector<1x32xf32> to vector<5x32xf32>
    %209 = arith.addf %207, %208 : vector<5x32xf32>
    %c0_87 = arith.constant 0 : index
    %c0_88 = arith.constant 0 : index
    %210 = vector.load %arg20[%c0_87, %c0_88] : memref<32x96xf32, #tpu.memory_space<vmem>>, vector<32x96xf32>
    %cst_89 = arith.constant dense<0.000000e+00> : vector<5x96xf32>
    %211 = tpu.matmul %209, %210, %cst_89 {dimension_numbers = #tpu.dot_dimension_numbers<[1], [0], [0], [1], [0, 0, 1, 1], [], []>} : vector<5x32xf32>, vector<32x96xf32>, vector<5x96xf32> -> vector<5x96xf32>
    %c0_90 = arith.constant 0 : index
    %c0_91 = arith.constant 0 : index
    %212 = vector.load %arg21[%c0_90, %c0_91] : memref<1x96xf32, #tpu.memory_space<vmem>>, vector<1x96xf32>
    %213 = vector.broadcast %212 : vector<1x96xf32> to vector<5x96xf32>
    %214 = arith.addf %211, %213 : vector<5x96xf32>
    %c0_92 = arith.constant 0 : index
    %c0_93 = arith.constant 0 : index
    %215 = vector.load %arg22[%c0_92, %c0_93] : memref<32x32xf32, #tpu.memory_space<vmem>>, vector<32x32xf32>
    %216 = vector.extract_strided_slice %214 {offsets = [0, 0], sizes = [5, 8], strides = [1, 1]} : vector<5x96xf32> to vector<5x8xf32>
    %cst_94 = arith.constant 0.353553385 : f32
    %217 = vector.broadcast %cst_94 : f32 to vector<5x8xf32>
    %218 = arith.mulf %216, %217 : vector<5x8xf32>
    %219 = vector.extract_strided_slice %214 {offsets = [0, 32], sizes = [5, 8], strides = [1, 1]} : vector<5x96xf32> to vector<5x8xf32>
    %220 = vector.extract_strided_slice %214 {offsets = [0, 64], sizes = [5, 8], strides = [1, 1]} : vector<5x96xf32> to vector<5x8xf32>
    %cst_95 = arith.constant dense<0.000000e+00> : vector<5x5xf32>
    %221 = tpu.matmul %218, %219, %cst_95 {dimension_numbers = #tpu.dot_dimension_numbers<[1], [1], [0], [0], [0, 0, 1, 0], [], []>} : vector<5x8xf32>, vector<5x8xf32>, vector<5x5xf32> -> vector<5x5xf32>
    %cst_96 = arith.constant dense<0xFF800000> : vector<5xf32>
    %222 = vector.multi_reduction <maximumf>, %221, %cst_96 [1] : vector<5x5xf32> to vector<5xf32>
    %223 = vector.shape_cast %222 : vector<5xf32> to vector<5x1xf32>
    %224 = vector.broadcast %223 : vector<5x1xf32> to vector<5x5xf32>
    %225 = arith.subf %221, %224 : vector<5x5xf32>
    %226 = math.exp %225 : vector<5x5xf32>
    %cst_97 = arith.constant dense<0.000000e+00> : vector<5xf32>
    %227 = vector.multi_reduction <add>, %226, %cst_97 [1] : vector<5x5xf32> to vector<5xf32>
    %228 = vector.shape_cast %227 : vector<5xf32> to vector<5x1xf32>
    %229 = tpu.reciprocal %228 {approx = true} : vector<5x1xf32> -> vector<5x1xf32>
    %230 = vector.broadcast %229 : vector<5x1xf32> to vector<5x5xf32>
    %231 = arith.mulf %226, %230 : vector<5x5xf32>
    %cst_98 = arith.constant dense<0.000000e+00> : vector<5x8xf32>
    %232 = tpu.matmul %231, %220, %cst_98 {dimension_numbers = #tpu.dot_dimension_numbers<[1], [0], [0], [1], [0, 0, 1, 1], [], []>} : vector<5x5xf32>, vector<5x8xf32>, vector<5x8xf32> -> vector<5x8xf32>
    %233 = vector.extract_strided_slice %215 {offsets = [0, 0], sizes = [8, 32], strides = [1, 1]} : vector<32x32xf32> to vector<8x32xf32>
    %cst_99 = arith.constant dense<0.000000e+00> : vector<5x32xf32>
    %234 = tpu.matmul %232, %233, %cst_99 {dimension_numbers = #tpu.dot_dimension_numbers<[1], [0], [0], [1], [0, 0, 1, 1], [], []>} : vector<5x8xf32>, vector<8x32xf32>, vector<5x32xf32> -> vector<5x32xf32>
    %235 = vector.extract_strided_slice %214 {offsets = [0, 8], sizes = [5, 8], strides = [1, 1]} : vector<5x96xf32> to vector<5x8xf32>
    %cst_100 = arith.constant 0.353553385 : f32
    %236 = vector.broadcast %cst_100 : f32 to vector<5x8xf32>
    %237 = arith.mulf %235, %236 : vector<5x8xf32>
    %238 = vector.extract_strided_slice %214 {offsets = [0, 40], sizes = [5, 8], strides = [1, 1]} : vector<5x96xf32> to vector<5x8xf32>
    %239 = vector.extract_strided_slice %214 {offsets = [0, 72], sizes = [5, 8], strides = [1, 1]} : vector<5x96xf32> to vector<5x8xf32>
    %cst_101 = arith.constant dense<0.000000e+00> : vector<5x5xf32>
    %240 = tpu.matmul %237, %238, %cst_101 {dimension_numbers = #tpu.dot_dimension_numbers<[1], [1], [0], [0], [0, 0, 1, 0], [], []>} : vector<5x8xf32>, vector<5x8xf32>, vector<5x5xf32> -> vector<5x5xf32>
    %cst_102 = arith.constant dense<0xFF800000> : vector<5xf32>
    %241 = vector.multi_reduction <maximumf>, %240, %cst_102 [1] : vector<5x5xf32> to vector<5xf32>
    %242 = vector.shape_cast %241 : vector<5xf32> to vector<5x1xf32>
    %243 = vector.broadcast %242 : vector<5x1xf32> to vector<5x5xf32>
    %244 = arith.subf %240, %243 : vector<5x5xf32>
    %245 = math.exp %244 : vector<5x5xf32>
    %cst_103 = arith.constant dense<0.000000e+00> : vector<5xf32>
    %246 = vector.multi_reduction <add>, %245, %cst_103 [1] : vector<5x5xf32> to vector<5xf32>
    %247 = vector.shape_cast %246 : vector<5xf32> to vector<5x1xf32>
    %248 = tpu.reciprocal %247 {approx = true} : vector<5x1xf32> -> vector<5x1xf32>
    %249 = vector.broadcast %248 : vector<5x1xf32> to vector<5x5xf32>
    %250 = arith.mulf %245, %249 : vector<5x5xf32>
    %cst_104 = arith.constant dense<0.000000e+00> : vector<5x8xf32>
    %251 = tpu.matmul %250, %239, %cst_104 {dimension_numbers = #tpu.dot_dimension_numbers<[1], [0], [0], [1], [0, 0, 1, 1], [], []>} : vector<5x5xf32>, vector<5x8xf32>, vector<5x8xf32> -> vector<5x8xf32>
    %252 = vector.extract_strided_slice %215 {offsets = [8, 0], sizes = [8, 32], strides = [1, 1]} : vector<32x32xf32> to vector<8x32xf32>
    %cst_105 = arith.constant dense<0.000000e+00> : vector<5x32xf32>
    %253 = tpu.matmul %251, %252, %cst_105 {dimension_numbers = #tpu.dot_dimension_numbers<[1], [0], [0], [1], [0, 0, 1, 1], [], []>} : vector<5x8xf32>, vector<8x32xf32>, vector<5x32xf32> -> vector<5x32xf32>
    %254 = arith.addf %234, %253 : vector<5x32xf32>
    %255 = vector.extract_strided_slice %214 {offsets = [0, 16], sizes = [5, 8], strides = [1, 1]} : vector<5x96xf32> to vector<5x8xf32>
    %cst_106 = arith.constant 0.353553385 : f32
    %256 = vector.broadcast %cst_106 : f32 to vector<5x8xf32>
    %257 = arith.mulf %255, %256 : vector<5x8xf32>
    %258 = vector.extract_strided_slice %214 {offsets = [0, 48], sizes = [5, 8], strides = [1, 1]} : vector<5x96xf32> to vector<5x8xf32>
    %259 = vector.extract_strided_slice %214 {offsets = [0, 80], sizes = [5, 8], strides = [1, 1]} : vector<5x96xf32> to vector<5x8xf32>
    %cst_107 = arith.constant dense<0.000000e+00> : vector<5x5xf32>
    %260 = tpu.matmul %257, %258, %cst_107 {dimension_numbers = #tpu.dot_dimension_numbers<[1], [1], [0], [0], [0, 0, 1, 0], [], []>} : vector<5x8xf32>, vector<5x8xf32>, vector<5x5xf32> -> vector<5x5xf32>
    %cst_108 = arith.constant dense<0xFF800000> : vector<5xf32>
    %261 = vector.multi_reduction <maximumf>, %260, %cst_108 [1] : vector<5x5xf32> to vector<5xf32>
    %262 = vector.shape_cast %261 : vector<5xf32> to vector<5x1xf32>
    %263 = vector.broadcast %262 : vector<5x1xf32> to vector<5x5xf32>
    %264 = arith.subf %260, %263 : vector<5x5xf32>
    %265 = math.exp %264 : vector<5x5xf32>
    %cst_109 = arith.constant dense<0.000000e+00> : vector<5xf32>
    %266 = vector.multi_reduction <add>, %265, %cst_109 [1] : vector<5x5xf32> to vector<5xf32>
    %267 = vector.shape_cast %266 : vector<5xf32> to vector<5x1xf32>
    %268 = tpu.reciprocal %267 {approx = true} : vector<5x1xf32> -> vector<5x1xf32>
    %269 = vector.broadcast %268 : vector<5x1xf32> to vector<5x5xf32>
    %270 = arith.mulf %265, %269 : vector<5x5xf32>
    %cst_110 = arith.constant dense<0.000000e+00> : vector<5x8xf32>
    %271 = tpu.matmul %270, %259, %cst_110 {dimension_numbers = #tpu.dot_dimension_numbers<[1], [0], [0], [1], [0, 0, 1, 1], [], []>} : vector<5x5xf32>, vector<5x8xf32>, vector<5x8xf32> -> vector<5x8xf32>
    %272 = vector.extract_strided_slice %215 {offsets = [16, 0], sizes = [8, 32], strides = [1, 1]} : vector<32x32xf32> to vector<8x32xf32>
    %cst_111 = arith.constant dense<0.000000e+00> : vector<5x32xf32>
    %273 = tpu.matmul %271, %272, %cst_111 {dimension_numbers = #tpu.dot_dimension_numbers<[1], [0], [0], [1], [0, 0, 1, 1], [], []>} : vector<5x8xf32>, vector<8x32xf32>, vector<5x32xf32> -> vector<5x32xf32>
    %274 = arith.addf %254, %273 : vector<5x32xf32>
    %275 = vector.extract_strided_slice %214 {offsets = [0, 24], sizes = [5, 8], strides = [1, 1]} : vector<5x96xf32> to vector<5x8xf32>
    %cst_112 = arith.constant 0.353553385 : f32
    %276 = vector.broadcast %cst_112 : f32 to vector<5x8xf32>
    %277 = arith.mulf %275, %276 : vector<5x8xf32>
    %278 = vector.extract_strided_slice %214 {offsets = [0, 56], sizes = [5, 8], strides = [1, 1]} : vector<5x96xf32> to vector<5x8xf32>
    %279 = vector.extract_strided_slice %214 {offsets = [0, 88], sizes = [5, 8], strides = [1, 1]} : vector<5x96xf32> to vector<5x8xf32>
    %cst_113 = arith.constant dense<0.000000e+00> : vector<5x5xf32>
    %280 = tpu.matmul %277, %278, %cst_113 {dimension_numbers = #tpu.dot_dimension_numbers<[1], [1], [0], [0], [0, 0, 1, 0], [], []>} : vector<5x8xf32>, vector<5x8xf32>, vector<5x5xf32> -> vector<5x5xf32>
    %cst_114 = arith.constant dense<0xFF800000> : vector<5xf32>
    %281 = vector.multi_reduction <maximumf>, %280, %cst_114 [1] : vector<5x5xf32> to vector<5xf32>
    %282 = vector.shape_cast %281 : vector<5xf32> to vector<5x1xf32>
    %283 = vector.broadcast %282 : vector<5x1xf32> to vector<5x5xf32>
    %284 = arith.subf %280, %283 : vector<5x5xf32>
    %285 = math.exp %284 : vector<5x5xf32>
    %cst_115 = arith.constant dense<0.000000e+00> : vector<5xf32>
    %286 = vector.multi_reduction <add>, %285, %cst_115 [1] : vector<5x5xf32> to vector<5xf32>
    %287 = vector.shape_cast %286 : vector<5xf32> to vector<5x1xf32>
    %288 = tpu.reciprocal %287 {approx = true} : vector<5x1xf32> -> vector<5x1xf32>
    %289 = vector.broadcast %288 : vector<5x1xf32> to vector<5x5xf32>
    %290 = arith.mulf %285, %289 : vector<5x5xf32>
    %cst_116 = arith.constant dense<0.000000e+00> : vector<5x8xf32>
    %291 = tpu.matmul %290, %279, %cst_116 {dimension_numbers = #tpu.dot_dimension_numbers<[1], [0], [0], [1], [0, 0, 1, 1], [], []>} : vector<5x5xf32>, vector<5x8xf32>, vector<5x8xf32> -> vector<5x8xf32>
    %292 = vector.extract_strided_slice %215 {offsets = [24, 0], sizes = [8, 32], strides = [1, 1]} : vector<32x32xf32> to vector<8x32xf32>
    %cst_117 = arith.constant dense<0.000000e+00> : vector<5x32xf32>
    %293 = tpu.matmul %291, %292, %cst_117 {dimension_numbers = #tpu.dot_dimension_numbers<[1], [0], [0], [1], [0, 0, 1, 1], [], []>} : vector<5x8xf32>, vector<8x32xf32>, vector<5x32xf32> -> vector<5x32xf32>
    %294 = arith.addf %274, %293 : vector<5x32xf32>
    %295 = arith.addf %185, %294 : vector<5x32xf32>
    %c0_118 = arith.constant 0 : index
    %c0_119 = arith.constant 0 : index
    %296 = vector.load %arg23[%c0_118, %c0_119] : memref<1x32xf32, #tpu.memory_space<vmem>>, vector<1x32xf32>
    %297 = vector.broadcast %296 : vector<1x32xf32> to vector<5x32xf32>
    %298 = arith.addf %295, %297 : vector<5x32xf32>
    %c0_120 = arith.constant 0 : index
    %c0_121 = arith.constant 0 : index
    %299 = vector.load %arg24[%c0_120, %c0_121] : memref<1x32xf32, #tpu.memory_space<vmem>>, vector<1x32xf32>
    %c0_122 = arith.constant 0 : index
    %c0_123 = arith.constant 0 : index
    %300 = vector.load %arg25[%c0_122, %c0_123] : memref<1x32xf32, #tpu.memory_space<vmem>>, vector<1x32xf32>
    %cst_124 = arith.constant dense<0.000000e+00> : vector<5xf32>
    %301 = vector.multi_reduction <add>, %298, %cst_124 [1] : vector<5x32xf32> to vector<5xf32>
    %302 = vector.shape_cast %301 : vector<5xf32> to vector<5x1xf32>
    %cst_125 = arith.constant 3.200000e+01 : f32
    %303 = vector.broadcast %cst_125 : f32 to vector<5x1xf32>
    %304 = arith.divf %302, %303 : vector<5x1xf32>
    %305 = vector.broadcast %304 : vector<5x1xf32> to vector<5x32xf32>
    %306 = arith.subf %298, %305 : vector<5x32xf32>
    %307 = arith.mulf %306, %306 : vector<5x32xf32>
    %cst_126 = arith.constant dense<0.000000e+00> : vector<5xf32>
    %308 = vector.multi_reduction <add>, %307, %cst_126 [1] : vector<5x32xf32> to vector<5xf32>
    %309 = vector.shape_cast %308 : vector<5xf32> to vector<5x1xf32>
    %cst_127 = arith.constant 3.200000e+01 : f32
    %310 = vector.broadcast %cst_127 : f32 to vector<5x1xf32>
    %311 = arith.divf %309, %310 : vector<5x1xf32>
    %312 = vector.broadcast %304 : vector<5x1xf32> to vector<5x32xf32>
    %313 = arith.subf %298, %312 : vector<5x32xf32>
    %cst_128 = arith.constant 9.99999974E-6 : f32
    %314 = vector.broadcast %cst_128 : f32 to vector<5x1xf32>
    %315 = arith.addf %311, %314 : vector<5x1xf32>
    %316 = math.rsqrt %315 : vector<5x1xf32>
    %317 = vector.broadcast %316 : vector<5x1xf32> to vector<5x32xf32>
    %318 = arith.mulf %313, %317 : vector<5x32xf32>
    %319 = vector.broadcast %299 : vector<1x32xf32> to vector<5x32xf32>
    %320 = arith.mulf %318, %319 : vector<5x32xf32>
    %321 = vector.broadcast %300 : vector<1x32xf32> to vector<5x32xf32>
    %322 = arith.addf %320, %321 : vector<5x32xf32>
    %c0_129 = arith.constant 0 : index
    %c0_130 = arith.constant 0 : index
    %323 = vector.load %arg26[%c0_129, %c0_130] : memref<32x128xf32, #tpu.memory_space<vmem>>, vector<32x128xf32>
    %cst_131 = arith.constant dense<0.000000e+00> : vector<5x128xf32>
    %324 = tpu.matmul %322, %323, %cst_131 {dimension_numbers = #tpu.dot_dimension_numbers<[1], [0], [0], [1], [0, 0, 1, 1], [], []>} : vector<5x32xf32>, vector<32x128xf32>, vector<5x128xf32> -> vector<5x128xf32>
    %c0_132 = arith.constant 0 : index
    %c0_133 = arith.constant 0 : index
    %325 = vector.load %arg27[%c0_132, %c0_133] : memref<1x128xf32, #tpu.memory_space<vmem>>, vector<1x128xf32>
    %326 = vector.broadcast %325 : vector<1x128xf32> to vector<5x128xf32>
    %327 = arith.addf %324, %326 : vector<5x128xf32>
    %cst_134 = arith.constant 1.702000e+00 : f32
    %328 = vector.broadcast %cst_134 : f32 to vector<5x128xf32>
    %329 = arith.mulf %328, %327 : vector<5x128xf32>
    %330 = arith.negf %329 : vector<5x128xf32>
    %331 = math.exp %330 : vector<5x128xf32>
    %cst_135 = arith.constant 1.000000e+00 : f32
    %332 = vector.broadcast %cst_135 : f32 to vector<5x128xf32>
    %333 = arith.addf %332, %331 : vector<5x128xf32>
    %334 = arith.divf %332, %333 : vector<5x128xf32>
    %335 = arith.mulf %327, %334 : vector<5x128xf32>
    %c0_136 = arith.constant 0 : index
    %c0_137 = arith.constant 0 : index
    %336 = vector.load %arg28[%c0_136, %c0_137] : memref<128x32xf32, #tpu.memory_space<vmem>>, vector<128x32xf32>
    %cst_138 = arith.constant dense<0.000000e+00> : vector<5x32xf32>
    %337 = tpu.matmul %335, %336, %cst_138 {dimension_numbers = #tpu.dot_dimension_numbers<[1], [0], [0], [1], [0, 0, 1, 1], [], []>} : vector<5x128xf32>, vector<128x32xf32>, vector<5x32xf32> -> vector<5x32xf32>
    %c0_139 = arith.constant 0 : index
    %c0_140 = arith.constant 0 : index
    %338 = vector.load %arg29[%c0_139, %c0_140] : memref<1x32xf32, #tpu.memory_space<vmem>>, vector<1x32xf32>
    %339 = vector.broadcast %338 : vector<1x32xf32> to vector<5x32xf32>
    %340 = arith.addf %337, %339 : vector<5x32xf32>
    %341 = arith.addf %298, %340 : vector<5x32xf32>
    %342 = vector.extract_strided_slice %341 {offsets = [0, 0], sizes = [1, 32], strides = [1, 1]} : vector<5x32xf32> to vector<1x32xf32>
    %c0_141 = arith.constant 0 : index
    %c0_142 = arith.constant 0 : index
    %343 = vector.load %arg30[%c0_141, %c0_142] : memref<1x32xf32, #tpu.memory_space<vmem>>, vector<1x32xf32>
    %c0_143 = arith.constant 0 : index
    %c0_144 = arith.constant 0 : index
    %344 = vector.load %arg31[%c0_143, %c0_144] : memref<1x32xf32, #tpu.memory_space<vmem>>, vector<1x32xf32>
    %cst_145 = arith.constant dense<0.000000e+00> : vector<1xf32>
    %345 = vector.multi_reduction <add>, %342, %cst_145 [1] : vector<1x32xf32> to vector<1xf32>
    %346 = vector.shape_cast %345 : vector<1xf32> to vector<1x1xf32>
    %cst_146 = arith.constant 3.200000e+01 : f32
    %347 = vector.broadcast %cst_146 : f32 to vector<1x1xf32>
    %348 = arith.divf %346, %347 : vector<1x1xf32>
    %349 = vector.broadcast %348 : vector<1x1xf32> to vector<1x32xf32>
    %350 = arith.subf %342, %349 : vector<1x32xf32>
    %351 = arith.mulf %350, %350 : vector<1x32xf32>
    %cst_147 = arith.constant dense<0.000000e+00> : vector<1xf32>
    %352 = vector.multi_reduction <add>, %351, %cst_147 [1] : vector<1x32xf32> to vector<1xf32>
    %353 = vector.shape_cast %352 : vector<1xf32> to vector<1x1xf32>
    %cst_148 = arith.constant 3.200000e+01 : f32
    %354 = vector.broadcast %cst_148 : f32 to vector<1x1xf32>
    %355 = arith.divf %353, %354 : vector<1x1xf32>
    %356 = vector.broadcast %348 : vector<1x1xf32> to vector<1x32xf32>
    %357 = arith.subf %342, %356 : vector<1x32xf32>
    %cst_149 = arith.constant 9.99999974E-6 : f32
    %358 = vector.broadcast %cst_149 : f32 to vector<1x1xf32>
    %359 = arith.addf %355, %358 : vector<1x1xf32>
    %360 = math.rsqrt %359 : vector<1x1xf32>
    %361 = vector.broadcast %360 : vector<1x1xf32> to vector<1x32xf32>
    %362 = arith.mulf %357, %361 : vector<1x32xf32>
    %363 = arith.mulf %362, %343 : vector<1x32xf32>
    %364 = arith.addf %363, %344 : vector<1x32xf32>
    %c0_150 = arith.constant 0 : index
    %c0_151 = arith.constant 0 : index
    %365 = vector.load %arg32[%c0_150, %c0_151] : memref<32x64xf32, #tpu.memory_space<vmem>>, vector<32x64xf32>
    %cst_152 = arith.constant dense<0.000000e+00> : vector<1x64xf32>
    %366 = tpu.matmul %364, %365, %cst_152 {dimension_numbers = #tpu.dot_dimension_numbers<[1], [0], [0], [1], [0, 0, 1, 1], [], []>} : vector<1x32xf32>, vector<32x64xf32>, vector<1x64xf32> -> vector<1x64xf32>
    %c0_153 = arith.constant 0 : index
    %c0_154 = arith.constant 0 : index
    %367 = vector.load %arg33[%c0_153, %c0_154] : memref<64x128xf32, #tpu.memory_space<vmem>>, vector<64x128xf32>
    %cst_155 = arith.constant dense<0.000000e+00> : vector<1x128xf32>
    %368 = tpu.matmul %366, %367, %cst_155 {dimension_numbers = #tpu.dot_dimension_numbers<[1], [0], [0], [1], [0, 0, 1, 1], [], []>} : vector<1x64xf32>, vector<64x128xf32>, vector<1x128xf32> -> vector<1x128xf32>
    %c0_156 = arith.constant 0 : index
    %c0_157 = arith.constant 0 : index
    %369 = vector.load %arg34[%c0_156, %c0_157] : memref<1x128xf32, #tpu.memory_space<vmem>>, vector<1x128xf32>
    %370 = arith.addf %368, %369 : vector<1x128xf32>
    %c0_158 = arith.constant 0 : index
    %c0_159 = arith.constant 0 : index
    %c0_160 = arith.constant 0 : index
    %371 = vector.load %arg35[%c0_158, %c0_159, %c0_160] : memref<1x1x128xf32, #tpu.memory_space<vmem>>, vector<1x1x128xf32>
    %372 = vector.shape_cast %371 : vector<1x1x128xf32> to vector<1x128xf32>
    %373 = vector.shape_cast %370 : vector<1x128xf32> to vector<1x1x128xf32>
    tpu.vector_store %arg35[%c0_158, %c0_159, %c0_160], %373 {strides = array<i32>} : memref<1x1x128xf32, #tpu.memory_space<vmem>>, vector<1x1x128xf32>,
    return
  }
  func.func @transform_0(%arg0: i32) -> (i32, i32, i32) {
    %c0_i32 = arith.constant 0 : i32
    %c0_i32_0 = arith.constant 0 : i32
    %c0_i32_1 = arith.constant 0 : i32
    return %arg0, %c0_i32, %c0_i32_0 : i32, i32, i32
  }
  func.func @transform_1(%arg0: i32) -> (i32, i32) {
    %c0_i32 = arith.constant 0 : i32
    %c0_i32_0 = arith.constant 0 : i32
    %c0_i32_1 = arith.constant 0 : i32
    return %c0_i32, %c0_i32_0 : i32, i32
  }
  func.func @transform_2(%arg0: i32) -> (i32, i32) {
    %c0_i32 = arith.constant 0 : i32
    %c0_i32_0 = arith.constant 0 : i32
    %c0_i32_1 = arith.constant 0 : i32
    return %c0_i32, %c0_i32_0 : i32, i32
  }
  func.func @transform_3(%arg0: i32) -> (i32, i32) {
    %c0_i32 = arith.constant 0 : i32
    %c0_i32_0 = arith.constant 0 : i32
    %c0_i32_1 = arith.constant 0 : i32
    return %c0_i32, %c0_i32_0 : i32, i32
  }
  func.func @transform_4(%arg0: i32) -> (i32, i32) {
    %c0_i32 = arith.constant 0 : i32
    %c0_i32_0 = arith.constant 0 : i32
    %c0_i32_1 = arith.constant 0 : i32
    return %c0_i32, %c0_i32_0 : i32, i32
  }
  func.func @transform_5(%arg0: i32) -> (i32, i32) {
    %c0_i32 = arith.constant 0 : i32
    %c0_i32_0 = arith.constant 0 : i32
    %c0_i32_1 = arith.constant 0 : i32
    return %c0_i32, %c0_i32_0 : i32, i32
  }
  func.func @transform_6(%arg0: i32) -> (i32, i32) {
    %c0_i32 = arith.constant 0 : i32
    %c0_i32_0 = arith.constant 0 : i32
    %c0_i32_1 = arith.constant 0 : i32
    return %c0_i32, %c0_i32_0 : i32, i32
  }
  func.func @transform_7(%arg0: i32) -> (i32, i32) {
    %c0_i32 = arith.constant 0 : i32
    %c0_i32_0 = arith.constant 0 : i32
    %c0_i32_1 = arith.constant 0 : i32
    return %c0_i32, %c0_i32_0 : i32, i32
  }
  func.func @transform_8(%arg0: i32) -> (i32, i32) {
    %c0_i32 = arith.constant 0 : i32
    %c0_i32_0 = arith.constant 0 : i32
    %c0_i32_1 = arith.constant 0 : i32
    return %c0_i32, %c0_i32_0 : i32, i32
  }
  func.func @transform_9(%arg0: i32) -> (i32, i32) {
    %c0_i32 = arith.constant 0 : i32
    %c0_i32_0 = arith.constant 0 : i32
    %c0_i32_1 = arith.constant 0 : i32
    return %c0_i32, %c0_i32_0 : i32, i32
  }
  func.func @transform_10(%arg0: i32) -> (i32, i32) {
    %c0_i32 = arith.constant 0 : i32
    %c0_i32_0 = arith.constant 0 : i32
    %c0_i32_1 = arith.constant 0 : i32
    return %c0_i32, %c0_i32_0 : i32, i32
  }
  func.func @transform_11(%arg0: i32) -> (i32, i32) {
    %c0_i32 = arith.constant 0 : i32
    %c0_i32_0 = arith.constant 0 : i32
    %c0_i32_1 = arith.constant 0 : i32
    return %c0_i32, %c0_i32_0 : i32, i32
  }
  func.func @transform_12(%arg0: i32) -> (i32, i32) {
    %c0_i32 = arith.constant 0 : i32
    %c0_i32_0 = arith.constant 0 : i32
    %c0_i32_1 = arith.constant 0 : i32
    return %c0_i32, %c0_i32_0 : i32, i32
  }
  func.func @transform_13(%arg0: i32) -> (i32, i32) {
    %c0_i32 = arith.constant 0 : i32
    %c0_i32_0 = arith.constant 0 : i32
    %c0_i32_1 = arith.constant 0 : i32
    return %c0_i32, %c0_i32_0 : i32, i32
  }
  func.func @transform_14(%arg0: i32) -> (i32, i32) {
    %c0_i32 = arith.constant 0 : i32
    %c0_i32_0 = arith.constant 0 : i32
    %c0_i32_1 = arith.constant 0 : i32
    return %c0_i32, %c0_i32_0 : i32, i32
  }
  func.func @transform_15(%arg0: i32) -> (i32, i32) {
    %c0_i32 = arith.constant 0 : i32
    %c0_i32_0 = arith.constant 0 : i32
    %c0_i32_1 = arith.constant 0 : i32
    return %c0_i32, %c0_i32_0 : i32, i32
  }
  func.func @transform_16(%arg0: i32) -> (i32, i32) {
    %c0_i32 = arith.constant 0 : i32
    %c0_i32_0 = arith.constant 0 : i32
    %c0_i32_1 = arith.constant 0 : i32
    return %c0_i32, %c0_i32_0 : i32, i32
  }
  func.func @transform_17(%arg0: i32) -> (i32, i32) {
    %c0_i32 = arith.constant 0 : i32
    %c0_i32_0 = arith.constant 0 : i32
    %c0_i32_1 = arith.constant 0 : i32
    return %c0_i32, %c0_i32_0 : i32, i32
  }
  func.func @transform_18(%arg0: i32) -> (i32, i32) {
    %c0_i32 = arith.constant 0 : i32
    %c0_i32_0 = arith.constant 0 : i32
    %c0_i32_1 = arith.constant 0 : i32
    return %c0_i32, %c0_i32_0 : i32, i32
  }
  func.func @transform_19(%arg0: i32) -> (i32, i32) {
    %c0_i32 = arith.constant 0 : i32
    %c0_i32_0 = arith.constant 0 : i32
    %c0_i32_1 = arith.constant 0 : i32
    return %c0_i32, %c0_i32_0 : i32, i32
  }
  func.func @transform_20(%arg0: i32) -> (i32, i32) {
    %c0_i32 = arith.constant 0 : i32
    %c0_i32_0 = arith.constant 0 : i32
    %c0_i32_1 = arith.constant 0 : i32
    return %c0_i32, %c0_i32_0 : i32, i32
  }
  func.func @transform_21(%arg0: i32) -> (i32, i32) {
    %c0_i32 = arith.constant 0 : i32
    %c0_i32_0 = arith.constant 0 : i32
    %c0_i32_1 = arith.constant 0 : i32
    return %c0_i32, %c0_i32_0 : i32, i32
  }
  func.func @transform_22(%arg0: i32) -> (i32, i32) {
    %c0_i32 = arith.constant 0 : i32
    %c0_i32_0 = arith.constant 0 : i32
    %c0_i32_1 = arith.constant 0 : i32
    return %c0_i32, %c0_i32_0 : i32, i32
  }
  func.func @transform_23(%arg0: i32) -> (i32, i32) {
    %c0_i32 = arith.constant 0 : i32
    %c0_i32_0 = arith.constant 0 : i32
    %c0_i32_1 = arith.constant 0 : i32
    return %c0_i32, %c0_i32_0 : i32, i32
  }
  func.func @transform_24(%arg0: i32) -> (i32, i32) {
    %c0_i32 = arith.constant 0 : i32
    %c0_i32_0 = arith.constant 0 : i32
    %c0_i32_1 = arith.constant 0 : i32
    return %c0_i32, %c0_i32_0 : i32, i32
  }
  func.func @transform_25(%arg0: i32) -> (i32, i32) {
    %c0_i32 = arith.constant 0 : i32
    %c0_i32_0 = arith.constant 0 : i32
    %c0_i32_1 = arith.constant 0 : i32
    return %c0_i32, %c0_i32_0 : i32, i32
  }
  func.func @transform_26(%arg0: i32) -> (i32, i32) {
    %c0_i32 = arith.constant 0 : i32
    %c0_i32_0 = arith.constant 0 : i32
    %c0_i32_1 = arith.constant 0 : i32
    return %c0_i32, %c0_i32_0 : i32, i32
  }
  func.func @transform_27(%arg0: i32) -> (i32, i32) {
    %c0_i32 = arith.constant 0 : i32
    %c0_i32_0 = arith.constant 0 : i32
    %c0_i32_1 = arith.constant 0 : i32
    return %c0_i32, %c0_i32_0 : i32, i32
  }
  func.func @transform_28(%arg0: i32) -> (i32, i32) {
    %c0_i32 = arith.constant 0 : i32
    %c0_i32_0 = arith.constant 0 : i32
    %c0_i32_1 = arith.constant 0 : i32
    return %c0_i32, %c0_i32_0 : i32, i32
  }
  func.func @transform_29(%arg0: i32) -> (i32, i32) {
    %c0_i32 = arith.constant 0 : i32
    %c0_i32_0 = arith.constant 0 : i32
    %c0_i32_1 = arith.constant 0 : i32
    return %c0_i32, %c0_i32_0 : i32, i32
  }
  func.func @transform_30(%arg0: i32) -> (i32, i32) {
    %c0_i32 = arith.constant 0 : i32
    %c0_i32_0 = arith.constant 0 : i32
    %c0_i32_1 = arith.constant 0 : i32
    return %c0_i32, %c0_i32_0 : i32, i32
  }
  func.func @transform_31(%arg0: i32) -> (i32, i32) {
    %c0_i32 = arith.constant 0 : i32
    %c0_i32_0 = arith.constant 0 : i32
    %c0_i32_1 = arith.constant 0 : i32
    return %c0_i32, %c0_i32_0 : i32, i32
  }
  func.func @transform_32(%arg0: i32) -> (i32, i32) {
    %c0_i32 = arith.constant 0 : i32
    %c0_i32_0 = arith.constant 0 : i32
    %c0_i32_1 = arith.constant 0 : i32
    return %c0_i32, %c0_i32_0 : i32, i32
  }
  func.func @transform_33(%arg0: i32) -> (i32, i32) {
    %c0_i32 = arith.constant 0 : i32
    %c0_i32_0 = arith.constant 0 : i32
    %c0_i32_1 = arith.constant 0 : i32
    return %c0_i32, %c0_i32_0 : i32, i32
  }
  func.func @transform_34(%arg0: i32) -> (i32, i32, i32) {
    %c0_i32 = arith.constant 0 : i32
    %c0_i32_0 = arith.constant 0 : i32
    %c0_i32_1 = arith.constant 0 : i32
    return %arg0, %c0_i32, %c0_i32_0 : i32, i32, i32
  }
}

</mosaic_0001>

<bundles_post_ra>
// kernel: custom_clip_v_forward.1
= control target key start
LH: loop header
LB: loop body
LE: loop exit
PB: predicated region body
PF: predicated region fallthrough
CT: control target
= control target key end

     0   :  { %s4843_s6 = smov 1   ;;  %s4844_s10 = smov 2   ;;  %s5561_s0 = inlined_call_operand.smem [shape: u32[35], index: -1, kind: input, shape index: {}] }
   0x1   :  { %s4900_s5 = sld [smem:[%s5561_s0]]   ;;  %s4845_s14 = smov 3  }
   0x2   :  { %s4905_s9 = sld [smem:[%s5561_s0 + %s4843_s6]]   ;;  %s4846_s18 = smov 4  }
   0x3   :  { %s4910_s13 = sld [smem:[%s5561_s0 + %s4844_s10]]   ;;  %s4847_s22 = smov 5  }
   0x4   :  { %s4915_s17 = sld [smem:[%s5561_s0 + %s4845_s14]]   ;;  %s4848_s26 = smov 6  }
   0x5   :  { %s4920_s21 = sld [smem:[%s5561_s0 + %s4846_s18]]   ;;  %s4849_s30 = smov 7  }
   0x6   :  { %s4925_s25 = sld [smem:[%s5561_s0 + %s4847_s22]]   ;;  %s4850_s4 = smov 8  }
   0x7   :  { %5584 = sst [smem:[#allocation5_spill]] %s4900_s5  ;;  %s4851_s10 = smov 9  }
   0x8   :  { %5585 = sst [smem:[#allocation6_spill]] %s4905_s9  ;;  %s4852_s15 = smov 10  }
   0x9   :  { %5586 = sst [smem:[#allocation7_spill]] %s4910_s13  ;;  %s4853_s20 = smov 11  }
   0xa   :  { %s4930_s29 = sld [smem:[%s5561_s0 + %s4848_s26]]   ;;  %s4854_s26 = smov 12  }
   0xb   :  { %s4935_s3 = sld [smem:[%s5561_s0 + %s4849_s30]]   ;;  %s4855_s1 = smov 13  }
   0xc   :  { %s4940_s8 = sld [smem:[%s5561_s0 + %s4850_s4]]   ;;  %s4856_s7 = smov 14  }
   0xd   :  { %s4945_s14 = sld [smem:[%s5561_s0 + %s4851_s10]]   ;;  %s4858_s22 = smov 16  }
   0xe   :  { %s4950_s19 = sld [smem:[%s5561_s0 + %s4852_s15]]   ;;  %s4857_s15 = smov 15  }
   0xf   :  { %s4955_s24 = sld [smem:[%s5561_s0 + %s4853_s20]]   ;;  %s4859_s28 = smov 17  }
  0x10   :  { %s4960_s30 = sld [smem:[%s5561_s0 + %s4854_s26]]  }
  0x11   :  { %5587 = sst [smem:[#allocation8_spill]] %s4935_s3 }
  0x12   :  { %5588 = sst [smem:[#allocation9_spill]] %s4940_s8 }
  0x13   :  { %s4965_s6 = sld [smem:[%s5561_s0 + %s4855_s1]]  }
  0x14   :  { %s4970_s12 = sld [smem:[%s5561_s0 + %s4856_s7]]   ;;  %s4860_s7 = smov 18  }
  0x15   :  { %s4975_s20 = sld [smem:[%s5561_s0 + %s4857_s15]]   ;;  %s4861_s15 = smov 19  }
  0x16   :  { %s4980_s27 = sld [smem:[%s5561_s0 + %s4858_s22]]   ;;  %s4862_s22 = smov 20  }
  0x17   :  { %s4985_s4 = sld [smem:[%s5561_s0 + %s4859_s28]]   ;;  %s4863_s28 = smov 21  }
  0x19   :  { %5589 = sst [smem:[#allocation10_spill]] %s4965_s6 }
  0x1a   :  { %5590 = sst [smem:[#allocation11_spill]] %s4970_s12 }
  0x1b   :  { %5591 = sst [smem:[#allocation12_spill]] %s4975_s20 }
  0x1c   :  { %5592 = sst [smem:[#allocation13_spill]] %s4980_s27 }
  0x1d   :  { %5593 = sst [smem:[#allocation14_spill]] %s4985_s4 }
  0x1e   :  { %s4990_s12 = sld [smem:[%s5561_s0 + %s4860_s7]]   ;;  %s4864_s7 = smov 22  }
  0x1f   :  { %s4995_s20 = sld [smem:[%s5561_s0 + %s4861_s15]]   ;;  %s4865_s15 = smov 23  }
  0x20   :  { %s5000_s27 = sld [smem:[%s5561_s0 + %s4862_s22]]   ;;  %s4866_s22 = smov 24  }
  0x21   :  { %s5005_s4 = sld [smem:[%s5561_s0 + %s4863_s28]]   ;;  %s4867_s28 = smov 25  }
  0x24   :  { %5594 = sst [smem:[#allocation15_spill]] %s4990_s12 }
  0x25   :  { %5595 = sst [smem:[#allocation16_spill]] %s4995_s20 }
  0x26   :  { %5596 = sst [smem:[#allocation17_spill]] %s5000_s27 }
  0x27   :  { %5597 = sst [smem:[#allocation18_spill]] %s5005_s4 }
  0x28   :  { %s5010_s12 = sld [smem:[%s5561_s0 + %s4864_s7]]   ;;  %s4868_s7 = smov 26  }
  0x29   :  { %s5015_s20 = sld [smem:[%s5561_s0 + %s4865_s15]]   ;;  %s4869_s15 = smov 27  }
  0x2a   :  { %s5020_s27 = sld [smem:[%s5561_s0 + %s4866_s22]]   ;;  %s4870_s22 = smov 28  }
  0x2b   :  { %s5025_s4 = sld [smem:[%s5561_s0 + %s4867_s28]]   ;;  %s4871_s28 = smov 29  }
  0x2e   :  { %5598 = sst [smem:[#allocation19_spill]] %s5010_s12 }
  0x2f   :  { %5599 = sst [smem:[#allocation20_spill]] %s5015_s20 }
  0x30   :  { %5600 = sst [smem:[#allocation21_spill]] %s5020_s27 }
  0x31   :  { %5601 = sst [smem:[#allocation22_spill]] %s5025_s4 }
  0x32   :  { %s5030_s12 = sld [smem:[%s5561_s0 + %s4868_s7]]   ;;  %s4872_s7 = smov 30  }
  0x33   :  { %s5035_s20 = sld [smem:[%s5561_s0 + %s4869_s15]]   ;;  %s4873_s15 = smov 31  }
  0x34   :  { %s5040_s27 = sld [smem:[%s5561_s0 + %s4870_s22]]   ;;  %s4874_s22 = smov 32  }
  0x35   :  { %s5045_s4 = sld [smem:[%s5561_s0 + %s4871_s28]]   ;;  %s4875_s28 = smov 33  }
  0x38   :  { %5602 = sst [smem:[#allocation23_spill]] %s5030_s12 }
  0x39   :  { %5603 = sst [smem:[#allocation24_spill]] %s5035_s20 }
  0x3a   :  { %5604 = sst [smem:[#allocation25_spill]] %s5040_s27 }
  0x3b   :  { %5605 = sst [smem:[#allocation26_spill]] %s5045_s4 }
  0x3c   :  { %s5050_s12 = sld [smem:[%s5561_s0 + %s4872_s7]]   ;;  %s4876_s7 = smov 34  }
  0x3d   :  { %s5055_s20 = sld [smem:[%s5561_s0 + %s4873_s15]]  }
  0x3e   :  { %s5060_s27 = sld [smem:[%s5561_s0 + %s4874_s22]]  }
  0x3f   :  { %s5065_s4 = sld [smem:[%s5561_s0 + %s4875_s28]]  }
  0x42   :  { %5606 = sst [smem:[#allocation27_spill]] %s5050_s12 }
  0x43   :  { %s5070_s12 = sld [smem:[%s5561_s0 + %s4876_s7]]  }
  0x45   :  { %5607 = sst [smem:[#allocation28_spill]] %s5065_s4 }
  0x46   :  { %74 = vsyncpa [#allocation3], 0 }
  0x47   :  { %76 = vsyncpa [#allocation3 + $0x1], 0  ;;  %s5072_s15 = smov 0   ;;  %s5074_s16 = smov 0  }
  0x48   :  { %s5076_s18 = smov 0   ;;  %s5078_s22 = smov 0  }
  0x49 LB: > { %s5608_s9 = sld [smem:[#allocation6_spill]]  ;;  %s5609_s6 = sld [smem:[#allocation10_spill]]  ;;  %s4837_s18 = sphi %s5076_s18, %s5647_s18   ;;  %s4833_s16 = sphi %s5074_s16, %s5646_s16   ;;  %s4829_s15 = sphi %s5072_s15, %s5645_s15   ;;  %s4841_s22 = sphi %s5078_s22, %s5648_s22  }
  0x4a   : > { %s5610_s3 = sld [smem:[#allocation8_spill]]  ;;  %s5093_s0 = sadd.s32 4294967295, %s4841_s22  }
  0x4b   : > { %s4057_s23 = sadd.s32 4294967294, %s4841_s22   ;;  %s5097_s26 = sadd.s32 1, %s4841_s22  }
  0x4c   : > { %s808_s28 = sadd.s32 1, %s4837_s18  ;;  %s805_s1 = ssub.s32 %s4841_s22, %s5097_s26 }
  0x4d   : > { %p818_p0 = scmp.ne.s32.totalorder %s4837_s18, %s4833_s16  ;;  %p806_p1 = scmp.eq.s32.totalorder %s805_s1, 0 }
  0x4e   : > { %p819_p2 = scmp.eq.s32.totalorder %s5093_s0, 3  ;;  %p824_p3 = scmp.ne.s32.totalorder %s4833_s16, %s4829_s15 }
  0x4f   : > { %p825_p4 = scmp.eq.s32.totalorder %s4057_s23, 3  ;;  %p4060_p7 = scmp.ge.s32.totalorder %s4841_s22, 1 }
  0x50   : > { %s5108_s2 = scalar_select %p806_p1, %s4837_s18, %s808_s28  }
  0x51   : > { %p5110_p5 = por %p819_p2, %p818_p0  ;;  %p5114_p6 = por %p825_p4, %p824_p3 }
  0x52   : > { %p950_p8 = scmp.lt.s32.totalorder %s4841_s22, 5 }
  0x54   : > { %p951_p9 = pnand %p4060_p7, %p950_p8 }
  0x55   : > { %v1042_v0 = vld [vmem:[%s5608_s9] sm:$0xff] (!%p951_p9)  ;;  %s5613_s5 = sld [smem:[#allocation5_spill]] (!%p951_p9)  ;;  %v1043_v1 = vld [vmem:[%s5608_s9 + $0x8] sm:$0xff] (!%p951_p9)  ;;  %v1044_v2 = vld [vmem:[%s5608_s9 + $0x10] sm:$0xff] (!%p951_p9)  ;;  %p1035_p10 = scmp.lt.s32.totalorder (!%p951_p9), %s5093_s0, 3  ;;  %v4877_v3 = vmov (!%p951_p9), 0.0|0.0  }
  0x56   : > { %954 = sbr.rel (%p951_p9) target bundleno = 9986 (0x2702), region = 156  ;;  %4514 = vmatprep.subr.bf16.mxu0 (!%p951_p9), %v4877_v3  ;;  %v4515_v4 = vpack.c.bf16 (!%p951_p9), %v1043_v1, %v1042_v0  ;;  %v1045_v5 = vld [vmem:[%s5608_s9 + $0x18] sm:$0xff] (!%p951_p9)  ;;  %4550 = vmatprep.subr.bf16.mxu1 (!%p951_p9), %v4877_v3  ;;  %v1046_v7 = vld [vmem:[%s5608_s9 + $0x20] sm:$0xff] (!%p951_p9)  ;;  %v1047_v8 = vld [vmem:[%s5608_s9 + $0x28] sm:$0xff] (!%p951_p9)  ;;  %vm1067_vm0 = vcmask (!%p951_p9), 523264   ;;  %s5614_s13 = sld [smem:[#allocation7_spill]] (!%p951_p9) }
  0x57   : > { %v4518_v6 = vpack.c.bf16 (!%p951_p9), %v1045_v5, %v1044_v2  ;;  %v4521_v9 = vpack.c.bf16 (!%p951_p9), %v1047_v8, %v1046_v7  ;;  %v1048_v10 = vld [vmem:[%s5608_s9 + $0x30] sm:$0xff] (!%p951_p9)  ;;  %v1049_v11 = vld [vmem:[%s5608_s9 + $0x38] sm:$0xff] (!%p951_p9)  ;;  %v1050_v14 = vld [vmem:[%s5608_s9 + $0x40] sm:$0xff] (!%p951_p9)  ;;  %vm1143_vm1 = vcmask (!%p951_p9), 258048   ;;  %vm4878_vm2 = vmmov (!%p951_p9), 0   ;;  %s5615_s8 = sld [smem:[#allocation9_spill]] (!%p951_p9) }
  0x58   : > { %4516 = vmatpush1.bf16.msra.mxu0 (!%p951_p9), %v4515_v4  ;;  %v4524_v13 = vpack.c.bf16 (!%p951_p9), %v1049_v11, %v1048_v10  ;;  %v1051_v15 = vld [vmem:[%s5608_s9 + $0x48] sm:$0xff] (!%p951_p9)  ;;  %v1052_v17 = vld [vmem:[%s5608_s9 + $0x50] sm:$0xff] (!%p951_p9)  ;;  %v1053_v18 = vld [vmem:[%s5608_s9 + $0x58] sm:$0xff] (!%p951_p9)  ;;  %vm1212_vm3 = vcmask (!%p951_p9), 261120   ;;  %s5577_s1 = smov (!%p951_p9), 96   ;;  %vm1294_vm4 = vcmask (!%p951_p9), 64512  }
  0x59   : > { %4517 = vmatprep.subr.bf16.mxu0 (!%p951_p9), %v4877_v3  ;;  %v4527_v16 = vpack.c.bf16 (!%p951_p9), %v1051_v15, %v1050_v14  ;;  %v4530_v19 = vpack.c.bf16 (!%p951_p9), %v1053_v18, %v1052_v17  ;;  %v1054_v20 = vld [vmem:[%s5608_s9 + $0x60] sm:$0xff] (!%p951_p9)  ;;  %v1055_v21 = vld [vmem:[%s5608_s9 + $0x68] sm:$0xff] (!%p951_p9)  ;;  %v1056_v23 = vld [vmem:[%s5608_s9 + $0x70] sm:$0xff] (!%p951_p9)  ;;  %vm1370_vm5 = vcmask (!%p951_p9), 36864   ;;  %vm1388_vm6 = vcmask (!%p951_p9), 1044480   ;;  %s5644_s4 = sld [smem:[#allocation28_spill]] (!%p951_p9) }
  0x5a   : > { %v4533_v22 = vpack.c.bf16 (!%p951_p9), %v1055_v21, %v1054_v20  ;;  %v1057_v24 = vld [vmem:[%s5608_s9 + $0x78] sm:$0xff] (!%p951_p9)  ;;  %v1058_v26 = vld [vmem:[%s5608_s9 + $0x80] sm:$0xff] (!%p951_p9)  ;;  %v1059_v27 = vld [vmem:[%s5608_s9 + $0x88] sm:$0xff] (!%p951_p9)  ;;  %vm1384_vm7 = vcmask (!%p951_p9), 39936   ;;  %vm3779_vm8 = vcmask (!%p951_p9), 253952  }
  0x5b   : > { %v4536_v25 = vpack.c.bf16 (!%p951_p9), %v1057_v24, %v1056_v23  ;;  %v4539_v28 = vpack.c.bf16 (!%p951_p9), %v1059_v27, %v1058_v26  ;;  %v1060_v29 = vld [vmem:[%s5608_s9 + $0x90] sm:$0xff] (!%p951_p9)  ;;  %v1061_v30 = vld [vmem:[%s5608_s9 + $0x98] sm:$0xff] (!%p951_p9)  ;;  %v1062_v32 = vld [vmem:[%s5608_s9 + $0xa0] sm:$0xff] (!%p951_p9) }
  0x5c   : > { %4519 = vmatpush1.bf16.msra.mxu0 (!%p951_p9), %v4518_v6  ;;  %v4542_v31 = vpack.c.bf16 (!%p951_p9), %v1061_v30, %v1060_v29  ;;  %v1063_v33 = vld [vmem:[%s5608_s9 + $0xa8] sm:$0xff] (!%p951_p9)  ;;  %v1064_v35 = vld [vmem:[%s5608_s9 + $0xb0] sm:$0xff] (!%p951_p9)  ;;  %v1065_v36 = vld [vmem:[%s5608_s9 + $0xb8] sm:$0xff] (!%p951_p9)  ;;  %v4879_v6 = vmov (!%p951_p9), 0.0  }
  0x5d   : > { %s1036_s11 = scalar_select %p1035_p10, %s5093_s0, 3  ;;  %4520 = vmatprep.subr.bf16.mxu0 %v4877_v3  ;;  %v4545_v34 = vpack.c.bf16 %v1063_v33, %v1062_v32  ;;  %v4548_v37 = vpack.c.bf16 %v1065_v36, %v1064_v35  ;;  %v1066_v39 = vld [vmem:[%s5614_s13] sm:$0x1f]  ;;  %v1202_v1 = vld [vmem:[%s5610_s3 + $0x8] sm:$0xff]  ;;  %v1203_v2 = vld [vmem:[%s5610_s3 + $0x10] sm:$0xff]  ;;  %4258 = vmatprep.mubr.msk.f32.mxu1 %vm4878_vm2, %v4879_v6 }
  0x5e   : > { %v4064_v53 = vld [vmem:[%s4915_s17] ss:$0 sm:$0xff]  ;;  %v1204_v5 = vld [vmem:[%s5610_s3 + $0x18] sm:$0xff] }
  0x5f   : > { %s4133_s23 = sshll.u32 %s1036_s11, 4  ;;  %v4065_v55 = vld [vmem:[%s4920_s21] ss:$0 sm:$0xff]  ;;  %v4554_v7 = vpack.c.bf16 %v1204_v5, %v1203_v2  ;;  %s5568_s11 = smov 88  }
  0x60   : > { %s5132_s28 = scalar_lea.vmem %s5613_s5, %s4133_s23  ;;  %4522 = vmatpush1.bf16.msra.mxu0 %v4521_v9  ;;  %v1201_v0 = vld [vmem:[%s5610_s3] sm:$0xff]  ;;  %s5572_s23 = smov 64  }
  0x61   : > { %v1041_v12 = vld [vmem:[%s5132_s28 + $0x8] sm:$0x1f]  ;;  %4523 = vmatprep.subr.bf16.mxu0 %v4877_v3  ;;  %v1040_v38 = vld [vmem:[%s5132_s28] sm:$0x1f]  ;;  %v4551_v4 = vpack.c.bf16 %v1202_v1, %v1201_v0  ;;  %s5567_s28 = smov 120   ;;  %s5622_s3 = sld [smem:[#allocation17_spill]] }
  0x62   : > { %4063 = vmatprep.mubr.msk.f32.mxu0 %vm1067_vm0, %v1041_v12  ;;  %v4066_v12 = vld [vmem:[%s4925_s25] ss:$0 sm:$0xff]  ;;  %s5639_s5 = sld [smem:[#allocation24_spill]] }
  0x63   : > { %4552 = vmatpush3.bf16.msra.mxu1 %v4551_v4  ;;  %v4067_v14 = vld [vmem:[%s4930_s29] ss:$0 sm:$0xff] }
  0x64   : > { %4525 = vmatpush1.bf16.msra.mxu0 %v4524_v13  ;;  %4553 = vmatprep.subr.bf16.mxu1 %v4877_v3  ;;  %v4068_v17 = vld [vmem:[%s5615_s8] ss:$0 sm:$0xff] }
  0x65   : > { %4526 = vmatprep.subr.bf16.mxu0 %v4877_v3 }
  0x67   : > { %4555 = vmatpush3.bf16.msra.mxu1 %v4554_v7 }
  0x68   : > { %4528 = vmatpush1.bf16.msra.mxu0 %v4527_v16  ;;  %4261 = vmatprep.subr.mxu1 %v4879_v6 }
  0x69   : > { %4529 = vmatprep.subr.bf16.mxu0 %v4877_v3 }
  0x6c   : > { %4531 = vmatpush1.bf16.msra.mxu0 %v4530_v19 }
  0x6d   : > { %4532 = vmatprep.subr.bf16.mxu0 %v4877_v3 }
  0x70   : > { %4534 = vmatpush1.bf16.msra.mxu0 %v4533_v22 }
  0x71   : > { %4535 = vmatprep.subr.bf16.mxu0 %v4877_v3 }
  0x74   : > { %4537 = vmatpush1.bf16.msra.mxu0 %v4536_v25 }
  0x75   : > { %4538 = vmatprep.subr.bf16.mxu0 %v4877_v3 }
  0x78   : > { %4540 = vmatpush1.bf16.msra.mxu0 %v4539_v28 }
  0x79   : > { %4541 = vmatprep.subr.bf16.mxu0 %v4877_v3 }
  0x7c   : > { %4543 = vmatpush1.bf16.msra.mxu0 %v4542_v31 }
  0x7d   : > { %4544 = vmatprep.subr.bf16.mxu0 %v4877_v3 }
  0x80   : > { %4546 = vmatpush1.bf16.msra.mxu0 %v4545_v34 }
  0x81   : > { %4547 = vmatprep.subr.bf16.mxu0 %v4877_v3 }
  0x84   : > { %4549 = vmatpush1.bf16.msra.mxu0 %v4548_v37 }
  0x85   : > { %4311 = vmatprep.subr.mxu0 %v4879_v6 }
  0x87   : > { %1136 = vmatmul.mubr.f32.vlgmr.msra.gmra.mrb[0].mxu0 %v1040_v38 }
  0x88   : > { %4313 = vmatprep.mubr.msk.f32.mxu0 %vm4878_vm2, %v4879_v6 }
 0x15a   : > { %v1137_v40 = vpop.f32.mrb[0].mxu0 }
 0x15b   : > { %v1138_v41 = vadd.f32 %v1137_v40, %v1066_v39  ;;  %v1139_v42 = vpop.f32.mrb[1].mxu0 }
 0x15d   : > { %v1144_v43 = vsel %vm1143_vm1, %v1138_v41, 0.0 }
 0x15e   : > { %1145 = vadd.xlane.f32.xlu0 %v1144_v43 }
 0x1eb   : > { %v1146_v44 = vpop.xlane.xlu0 %1145 }
 0x1ec   : > { %v1148_v45 = vmul.f32 0.03125, %v1146_v44 }
 0x1ee   : > { %v1149_v46 = vsub.f32 %v1138_v41, %v1148_v45 }
 0x1f0   : > { %v1150_v47 = vmul.f32 %v1149_v46, %v1149_v46 }
 0x1f2   : > { %v1151_v48 = vsel %vm1143_vm1, %v1150_v47, 0.0 }
 0x1f3   : > { %1152 = vadd.xlane.f32.xlu0 %v1151_v48 }
 0x280   : > { %v1153_v49 = vpop.xlane.xlu0 %1152 }
 0x281   : > { %v1154_v50 = vmul.f32 0.03125, %v1153_v49 }
 0x283   : > { %v1155_v51 = vadd.f32 1e-05, %v1154_v50 }
 0x285   : > { %4727 = vrsqrt.f32 %v1155_v51  ;;  %v1287_v51 = vld [vmem:[%s4945_s14 + $0x8] sm:$0xff] }
 0x28f   : > { %v4728_v52 = vpop.eup %4727 }
 0x290   : > { %v1157_v54 = vmul.f32 %v4728_v52, %v1149_v46  ;;  %v1286_v52 = vld [vmem:[%s4945_s14] sm:$0xff] }
 0x292   : > { %v1164_v56 = vmul.f32 %v4064_v53, %v1157_v54 }
 0x294   : > { %v5170_v57 = vadd.f32 %v4065_v55, %v1164_v56 }
 0x296   : > { %v1174_v58 = vsel %vm1143_vm1, %v5170_v57, 0.0 }
 0x297   : > { %1175 = vadd.xlane.f32.xlu1 %v1174_v58 }
 0x324   : > { %v1176_v59 = vpop.xlane.xlu1 %1175 }
 0x325   : > { %v1177_v60 = vmul.f32 0.03125, %v1176_v59 }
 0x327   : > { %v1178_v61 = vsub.f32 %v5170_v57, %v1177_v60 }
 0x329   : > { %v1179_v62 = vmul.f32 %v1178_v61, %v1178_v61 }
 0x32b   : > { %v1180_v63 = vsel %vm1143_vm1, %v1179_v62, 0.0 }
 0x32c   : > { %1181 = vadd.xlane.f32.xlu1 %v1180_v63 }
 0x3b9   : > { %v1182_v8 = vpop.xlane.xlu1 %1181 }
 0x3ba   : > { %v1183_v9 = vmul.f32 0.03125, %v1182_v8 }
 0x3bc   : > { %v1184_v10 = vadd.f32 1e-05, %v1183_v9 }
 0x3be   : > { %4729 = vrsqrt.f32 %v1184_v10 }
 0x3c8   : > { %v4730_v11 = vpop.eup %4729 }
 0x3c9   : > { %v1186_v13 = vmul.f32 %v4730_v11, %v1178_v61 }
 0x3cb   : > { %v1193_v15 = vmul.f32 %v4066_v12, %v1186_v13  ;;  %v1288_v13 = vld [vmem:[%s4945_s14 + $0x10] sm:$0xff] }
 0x3cd   : > { %v1200_v16 = vadd.f32 %v4067_v14, %v1193_v15 }
 0x3cf   : > { %4259 = vmatmul.mubr.msk.f32.vlgmr.msra.gmra.mrb[0].mxu1 %vm1212_vm3, %v1200_v16 }
 0x3d0   : > { %4263 = vmatprep.mubr.msk.f32.mxu1 %vm4878_vm2, %v4879_v6 }
 0x4a2   : > { %v1282_v18 = vpop.f32.mrb[0].mxu1 }
 0x4a3   : > { %v5193_v19 = vadd.f32 %v4068_v17, %v1282_v18  ;;  %v4260_v20 = vpop.f32.mrb[1].mxu1 }
 0x4a5   : > { %1292 = vrot.lane.b32.xlu0 %v5193_v19, %s5577_s1  ;;  %v5201_v22 = vmul.f32 0.35355338, %v5193_v19  ;;  %s5619_s1 = sld [smem:[#allocation16_spill]] }
 0x4a9   : > { %1463 = vrot.lane.b32.xlu0 %v5193_v19, %s5568_s11  ;;  %s5570_s11 = smov 112  }
 0x517   : > { %v1293_v21 = vpop.permute.xlu0 %1292 }
 0x518   : > { %4262 = vmatpush3.xpose.msk.msra.mxu1 %vm1294_vm4, %v1293_v21 }
 0x519   : > { %4266 = vmatprep.subr.mxu1 %v4879_v6 }
 0x51b   : > { %4264 = vmatmul.mubr.msk.f32.vlgmr.msra.gmra.mrb[2].mxu1 %vm1294_vm4, %v5201_v22  ;;  %v1464_v35 = vpop.permute.xlu0 %1463 }
 0x51c   : > { %4268 = vmatprep.mubr.msk.f32.mxu1 %vm4878_vm2, %v4879_v6 }
 0x5ee   : > { %v1366_v23 = vpop.f32.mrb[2].mxu1 }
 0x5ef   : > { %v4265_v24 = vpop.f32.mrb[3].mxu1  ;;  %v1371_v25 = vsel %vm1370_vm5, %v1366_v23, -inf }
 0x5f0   : > { %1372 = vmax.xlane.f32.xlu1 %v1371_v25 }
 0x601   : > { %1382 = vrot.lane.b32.xlu1 %v5193_v19, %s5572_s23  ;;  %s5576_s23 = smov 48  }
 0x67d   : > { %v1373_v26 = vpop.xlane.xlu1 %1372 }
 0x67e   : > { %v1374_v27 = vsub.f32 %v1366_v23, %v1373_v26 }
 0x680   : > { %v1375_v28 = vmul.f32 1.442695, %v1374_v27 }
 0x681   : > { %v1383_v29 = vpop.permute.xlu1 %1382 }
 0x682   : > { %4731 = vpow2.f32 %v1375_v28  ;;  %4267 = vmatpush3.msk.msra.mxu1 %vm1388_vm6, %v1383_v29 }
 0x683   : > { %4271 = vmatprep.subr.mxu1 %v4879_v6 }
 0x68c   : > { %v4732_v30 = vpop.eup %4731 }
 0x68d   : > { %v1377_v31 = vsel %vm1370_vm5, %v4732_v30, 0.0 }
 0x68e   : > { %1378 = vadd.xlane.f32.xlu1 %v1377_v31  ;;  %v1289_v31 = vld [vmem:[%s4945_s14 + $0x18] sm:$0xff] }
 0x69f   : > { %1461 = vrot.lane.b32.xlu1 %v5201_v22, %s5567_s28  ;;  %s5569_s28 = smov 56  }
 0x71b   : > { %v1379_v32 = vpop.xlane.xlu1 %1378 }
 0x71c   : > { %4733 = vrcp.f32 %v1379_v32 }
 0x71f   : > { %v1462_v36 = vpop.permute.xlu1 %1461 }
 0x726   : > { %v4734_v33 = vpop.eup %4733 }
 0x727   : > { %v1381_v34 = vmul.f32 %v4734_v33, %v4732_v30 }
 0x729   : > { %4269 = vmatmul.mubr.msk.f32.vlgmr.msra.gmra.mrb[4].mxu1 %vm1384_vm7, %v1381_v34 }
 0x72a   : > { %4272 = vmatpush3.xpose.msk.msra.mxu1 %vm1294_vm4, %v1464_v35  ;;  %4273 = vmatprep.mubr.msk.f32.mxu1 %vm4878_vm2, %v4879_v6 }
 0x72b   : > { %4276 = vmatprep.subr.mxu1 %v4879_v6 }
 0x72d   : > { %4274 = vmatmul.mubr.msk.f32.vlgmr.msra.gmra.mrb[6].mxu1 %vm1294_vm4, %v1462_v36 }
 0x72e   : > { %4278 = vmatprep.mubr.msk.f32.mxu1 %vm4878_vm2, %v4879_v6 }
 0x7fc   : > { %v1457_v37 = vpop.f32.mrb[4].mxu1 }
 0x7fd   : > { %v4270_v38 = vpop.f32.mrb[5].mxu1 }
 0x800   : > { %v1535_v39 = vpop.f32.mrb[6].mxu1 }
 0x801   : > { %v4275_v40 = vpop.f32.mrb[7].mxu1  ;;  %v1539_v41 = vsel %vm1370_vm5, %v1535_v39, -inf }
 0x802   : > { %1540 = vmax.xlane.f32.xlu0 %v1539_v41 }
 0x818   : > { %1550 = vrot.lane.b32.xlu0 %v5193_v19, %s5569_s28  ;;  %s5571_s28 = smov 80  }
 0x81c   : > { %1773 = vrot.lane.b32.xlu0 %v5201_v22, %s5570_s11  ;;  %s5575_s11 = smov 72  }
 0x88f   : > { %v1541_v42 = vpop.xlane.xlu0 %1540 }
 0x890   : > { %v1542_v43 = vsub.f32 %v1535_v39, %v1541_v42  ;;  %v4090_v39 = vld [vmem:[%s4950_s19] ss:$0 sm:$0xff] }
 0x892   : > { %v1543_v44 = vmul.f32 1.442695, %v1542_v43 }
 0x893   : > { %v1551_v45 = vpop.permute.xlu0 %1550 }
 0x894   : > { %4735 = vpow2.f32 %v1543_v44  ;;  %4277 = vmatpush3.msk.msra.mxu1 %vm1388_vm6, %v1551_v45 }
 0x895   : > { %4281 = vmatprep.subr.mxu1 %v4879_v6 }
 0x897   : > { %v1774_v56 = vpop.permute.xlu0 %1773 }
 0x89e   : > { %v4736_v46 = vpop.eup %4735 }
 0x89f   : > { %v1545_v47 = vsel %vm1370_vm5, %v4736_v46, 0.0 }
 0x8a0   : > { %1546 = vadd.xlane.f32.xlu1 %v1545_v47 }
 0x8b1   : > { %1775 = vrot.lane.b32.xlu1 %v5193_v19, %s5571_s28  ;;  %s5573_s28 = smov 104  }
 0x92d   : > { %v1547_v48 = vpop.xlane.xlu1 %1546 }
 0x92e   : > { %4737 = vrcp.f32 %v1547_v48  ;;  %v2291_v48 = vld [vmem:[%s5609_s6] sm:$0xff] }
 0x931   : > { %v1776_v55 = vpop.permute.xlu1 %1775 }
 0x938   : > { %v4738_v49 = vpop.eup %4737 }
 0x939   : > { %v1549_v50 = vmul.f32 %v4738_v49, %v4736_v46  ;;  %v2292_v49 = vld [vmem:[%s5609_s6 + $0x8] sm:$0xff] }
 0x93b   : > { %4279 = vmatmul.mubr.msk.f32.vlgmr.msra.gmra.mrb[8].mxu1 %vm1384_vm7, %v1549_v50  ;;  %v4557_v50 = vpack.c.bf16 %v2292_v49, %v2291_v48  ;;  %v2507_v48 = vld [vmem:[%s5619_s1 + $0x8] sm:$0xff] }
 0x93c   : > { %4282 = vmatpush3.msra.mxu1 %v1287_v51  ;;  %4283 = vmatprep.mubr.msk.f32.mxu1 %vm4878_vm2, %v4879_v6  ;;  %v2294_v51 = vld [vmem:[%s5609_s6 + $0x18] sm:$0xff] }
 0x93d   : > { %4286 = vmatprep.subr.mxu1 %v4879_v6 }
 0xa0e   : > { %v1623_v53 = vpop.f32.mrb[8].mxu1 }
 0xa0f   : > { %v4280_v54 = vpop.f32.mrb[9].mxu1  ;;  %4284 = vmatmul.mubr.msk.f32.vlgmr.msra.gmra.mrb[10].mxu1 %vm1294_vm4, %v1623_v53 }
 0xa10   : > { %4287 = vmatpush3.msra.mxu1 %v1286_v52  ;;  %4288 = vmatprep.mubr.msk.f32.mxu1 %vm4878_vm2, %v4879_v6 }
 0xa11   : > { %4291 = vmatprep.subr.mxu1 %v4879_v6 }
 0xa13   : > { %4289 = vmatmul.mubr.msk.f32.vlgmr.msra.gmra.mrb[12].mxu1 %vm1294_vm4, %v1457_v37 }
 0xa14   : > { %4293 = vmatprep.mubr.msk.f32.mxu1 %vm4878_vm2, %v4879_v6 }
 0xa17   : > { %4292 = vmatpush3.xpose.msk.msra.mxu1 %vm1294_vm4, %v1776_v55 }
 0xa18   : > { %4296 = vmatprep.subr.mxu1 %v4879_v6 }
 0xa1a   : > { %4294 = vmatmul.mubr.msk.f32.vlgmr.msra.gmra.mrb[14].mxu1 %vm1294_vm4, %v1774_v56 }
 0xa1b   : > { %4298 = vmatprep.mubr.msk.f32.mxu1 %vm4878_vm2, %v4879_v6 }
 0xae2   : > { %v1696_v58 = vpop.f32.mrb[10].mxu1 }
 0xae3   : > { %v4285_v59 = vpop.f32.mrb[11].mxu1 }
 0xae6   : > { %v1769_v60 = vpop.f32.mrb[12].mxu1 }
 0xae7   : > { %v1770_v61 = vadd.f32 %v1769_v60, %v1696_v58  ;;  %v4290_v62 = vpop.f32.mrb[13].mxu1  ;;  %v4091_v58 = vld [vmem:[%s4955_s24] ss:$0 sm:$0xff] }
 0xae8   : > { %v4092_v60 = vld [vmem:[%s4960_s30] ss:$0 sm:$0xff] }
 0xaed   : > { %v1847_v63 = vpop.f32.mrb[14].mxu1 }
 0xaee   : > { %v4295_v0 = vpop.f32.mrb[15].mxu1  ;;  %v1851_v1 = vsel %vm1370_vm5, %v1847_v63, -inf }
 0xaef   : > { %1852 = vmax.xlane.f32.xlu1 %v1851_v1 }
 0xb00   : > { %2015 = vrot.lane.b32.xlu1 %v5193_v19, %s5575_s11  ;;  %s5617_s11 = sld [smem:[#allocation11_spill]] }
 0xb04   : > { %2013 = vrot.lane.b32.xlu1 %v5201_v22, %s5573_s28  ;;  %s5574_s28 = smov 40  }
 0xb7c   : > { %v1853_v2 = vpop.xlane.xlu1 %1852 }
 0xb7d   : > { %v1854_v4 = vsub.f32 %v1847_v63, %v1853_v2 }
 0xb7f   : > { %v1855_v5 = vmul.f32 1.442695, %v1854_v4 }
 0xb80   : > { %v2016_v14 = vpop.permute.xlu1 %2015 }
 0xb81   : > { %4739 = vpow2.f32 %v1855_v5 }
 0xb84   : > { %v2014_v17 = vpop.permute.xlu1 %2013 }
 0xb8b   : > { %v4740_v7 = vpop.eup %4739 }
 0xb8c   : > { %v1857_v8 = vsel %vm1370_vm5, %v4740_v7, 0.0 }
 0xb8d   : > { %1858 = vadd.xlane.f32.xlu0 %v1857_v8 }
 0xba3   : > { %1862 = vrot.lane.b32.xlu0 %v5193_v19, %s5576_s23  ;;  %s5618_s23 = sld [smem:[#allocation13_spill]] }
 0xc1a   : > { %v1859_v9 = vpop.xlane.xlu0 %1858 }
 0xc1b   : > { %4741 = vrcp.f32 %v1859_v9 }
 0xc1e   : > { %v1863_v10 = vpop.permute.xlu0 %1862 }
 0xc1f   : > { %4297 = vmatpush3.msk.msra.mxu1 %vm1388_vm6, %v1863_v10 }
 0xc20   : > { %4301 = vmatprep.subr.mxu1 %v4879_v6 }
 0xc25   : > { %v4742_v11 = vpop.eup %4741 }
 0xc26   : > { %v1861_v12 = vmul.f32 %v4742_v11, %v4740_v7 }
 0xc28   : > { %4299 = vmatmul.mubr.msk.f32.vlgmr.msra.gmra.mrb[16].mxu1 %vm1384_vm7, %v1861_v12 }
 0xc29   : > { %4302 = vmatpush3.msra.mxu1 %v1288_v13  ;;  %4303 = vmatprep.mubr.msk.f32.mxu1 %vm4878_vm2, %v4879_v6 }
 0xc2a   : > { %4306 = vmatprep.subr.mxu1 %v4879_v6 }
 0xcfb   : > { %v1935_v15 = vpop.f32.mrb[16].mxu1 }
 0xcfc   : > { %v4300_v16 = vpop.f32.mrb[17].mxu1  ;;  %4304 = vmatmul.mubr.msk.f32.vlgmr.msra.gmra.mrb[18].mxu1 %vm1294_vm4, %v1935_v15 }
 0xcfd   : > { %4307 = vmatpush3.xpose.msk.msra.mxu1 %vm1294_vm4, %v2016_v14  ;;  %4308 = vmatprep.mubr.msk.f32.mxu1 %vm4878_vm2, %v4879_v6 }
 0xcfe   : > { %4316 = vmatprep.subr.mxu1 %v4879_v6 }
 0xd00   : > { %4309 = vmatmul.mubr.msk.f32.vlgmr.msra.gmra.mrb[20].mxu1 %vm1294_vm4, %v2014_v17 }
 0xd01   : > { %4318 = vmatprep.mubr.msk.f32.mxu1 %vm4878_vm2, %v4879_v6  ;;  %4317 = vmatpush3.msra.mxu1 %v1289_v31 }
 0xd02   : > { %4562 = vmatprep.subr.bf16.mxu1 %v4877_v3 }
 0xdcf   : > { %v2008_v18 = vpop.f32.mrb[18].mxu1 }
 0xdd0   : > { %v2012_v20 = vadd.f32 %v2008_v18, %v1770_v61  ;;  %v4305_v21 = vpop.f32.mrb[19].mxu1 }
 0xdd3   : > { %v2087_v22 = vpop.f32.mrb[20].mxu1 }
 0xdd4   : > { %v4310_v23 = vpop.f32.mrb[21].mxu1  ;;  %v2091_v24 = vsel %vm1370_vm5, %v2087_v22, -inf }
 0xdd5   : > { %2092 = vmax.xlane.f32.xlu0 %v2091_v24 }
 0xdeb   : > { %2102 = vrot.lane.b32.xlu0 %v5193_v19, %s5574_s28  ;;  %s5616_s28 = sld [smem:[#allocation12_spill]] }
 0xdf1   : > { %v2383_v63 = vld [vmem:[%s5616_s28] sm:$0xff]  ;;  %v2384_v0 = vld [vmem:[%s5616_s28 + $0x8] sm:$0xff]  ;;  %v2385_v2 = vld [vmem:[%s5616_s28 + $0x10] sm:$0xff] }
 0xdf2   : > { %v4563_v1 = vpack.c.bf16 %v2384_v0, %v2383_v63  ;;  %v2386_v4 = vld [vmem:[%s5616_s28 + $0x18] sm:$0xff]  ;;  %v2387_v7 = vld [vmem:[%s5616_s28 + $0x20] sm:$0xff]  ;;  %v2388_v8 = vld [vmem:[%s5616_s28 + $0x28] sm:$0xff] }
 0xdf3   : > { %v4566_v5 = vpack.c.bf16 %v2386_v4, %v2385_v2  ;;  %v4569_v9 = vpack.c.bf16 %v2388_v8, %v2387_v7  ;;  %v2389_v10 = vld [vmem:[%s5616_s28 + $0x30] sm:$0xff]  ;;  %v2390_v11 = vld [vmem:[%s5616_s28 + $0x38] sm:$0xff]  ;;  %v2391_v13 = vld [vmem:[%s5616_s28 + $0x40] sm:$0xff] }
 0xdf4   : > { %v4572_v12 = vpack.c.bf16 %v2390_v11, %v2389_v10  ;;  %v2392_v14 = vld [vmem:[%s5616_s28 + $0x48] sm:$0xff]  ;;  %v2393_v16 = vld [vmem:[%s5616_s28 + $0x50] sm:$0xff]  ;;  %v2394_v17 = vld [vmem:[%s5616_s28 + $0x58] sm:$0xff] }
 0xdf5   : > { %v4575_v15 = vpack.c.bf16 %v2392_v14, %v2391_v13  ;;  %v4578_v18 = vpack.c.bf16 %v2394_v17, %v2393_v16  ;;  %v2396_v21 = vld [vmem:[%s5616_s28 + $0x68] sm:$0xff]  ;;  %v2397_v23 = vld [vmem:[%s5616_s28 + $0x70] sm:$0xff]  ;;  %v2398_v24 = vld [vmem:[%s5616_s28 + $0x78] sm:$0xff] }
 0xe62   : > { %v2093_v25 = vpop.xlane.xlu0 %2092 }
 0xe63   : > { %v2094_v26 = vsub.f32 %v2087_v22, %v2093_v25  ;;  %v4584_v25 = vpack.c.bf16 %v2398_v24, %v2397_v23 }
 0xe65   : > { %v2095_v27 = vmul.f32 1.442695, %v2094_v26  ;;  %v4093_v26 = vld [vmem:[%s5617_s11] ss:$0 sm:$0xff]  ;;  %s5620_s11 = sld [smem:[#allocation14_spill]] }
 0xe66   : > { %v2103_v28 = vpop.permute.xlu0 %2102 }
 0xe67   : > { %4743 = vpow2.f32 %v2095_v27  ;;  %4312 = vmatpush3.msk.msra.mxu0 %vm1388_vm6, %v2103_v28 }
 0xe68   : > { %4556 = vmatprep.subr.bf16.mxu0 %v4877_v3 }
 0xe71   : > { %v4744_v29 = vpop.eup %4743 }
 0xe72   : > { %v2097_v30 = vsel %vm1370_vm5, %v4744_v29, 0.0 }
 0xe73   : > { %2098 = vadd.xlane.f32.xlu1 %v2097_v30 }
 0xf00   : > { %v2099_v32 = vpop.xlane.xlu1 %2098 }
 0xf01   : > { %4745 = vrcp.f32 %v2099_v32 }
 0xf0b   : > { %v4746_v19 = vpop.eup %4745 }
 0xf0c   : > { %v2101_v33 = vmul.f32 %v4746_v19, %v4744_v29 }
 0xf0e   : > { %4314 = vmatmul.mubr.msk.f32.vlgmr.msra.gmra.mrb[2].mxu0 %vm1384_vm7, %v2101_v33 }
 0xf0f   : > { %4329 = vmatprep.mubr.msk.f32.mxu0 %vm4878_vm2, %v4879_v6  ;;  %4558 = vmatpush3.bf16.msra.mxu0 %v4557_v50  ;;  %v2509_v50 = vld [vmem:[%s5619_s1 + $0x18] sm:$0xff] }
 0xf10   : > { %4559 = vmatprep.subr.bf16.mxu0 %v4877_v3 }
 0xfe1   : > { %v2175_v34 = vpop.f32.mrb[2].mxu0 }
 0xfe2   : > { %v4315_v35 = vpop.f32.mrb[3].mxu0  ;;  %4319 = vmatmul.mubr.msk.f32.vlgmr.msra.gmra.mrb[22].mxu1 %vm1294_vm4, %v2175_v34 }
 0xfe3   : > { %4364 = vmatprep.mubr.msk.f32.mxu1 %vm4878_vm2, %v4879_v6  ;;  %4564 = vmatpush3.bf16.msra.mxu1 %v4563_v1  ;;  %v4096_v35 = vld [vmem:[%s5618_s23] ss:$0 sm:$0xff]  ;;  %s5621_s23 = sld [smem:[#allocation15_spill]] }
 0xfe4   : > { %4565 = vmatprep.subr.bf16.mxu1 %v4877_v3 }
 0xfe7   : > { %4567 = vmatpush3.bf16.msra.mxu1 %v4566_v5 }
 0xfe8   : > { %4568 = vmatprep.subr.bf16.mxu1 %v4877_v3 }
 0xfeb   : > { %4570 = vmatpush3.bf16.msra.mxu1 %v4569_v9 }
 0xfec   : > { %4571 = vmatprep.subr.bf16.mxu1 %v4877_v3 }
 0xfef   : > { %4573 = vmatpush3.bf16.msra.mxu1 %v4572_v12 }
 0xff0   : > { %4574 = vmatprep.subr.bf16.mxu1 %v4877_v3 }
 0xff3   : > { %4576 = vmatpush3.bf16.msra.mxu1 %v4575_v15 }
 0xff4   : > { %4577 = vmatprep.subr.bf16.mxu1 %v4877_v3 }
 0xff7   : > { %4579 = vmatpush3.bf16.msra.mxu1 %v4578_v18 }
 0xff8   : > { %4580 = vmatprep.subr.bf16.mxu1 %v4877_v3 }
0x10b5   : > { %v2248_v36 = vpop.f32.mrb[22].mxu1 }
0x10b6   : > { %v2252_v37 = vadd.f32 %v2248_v36, %v2012_v20  ;;  %v4320_v38 = vpop.f32.mrb[23].mxu1  ;;  %v2395_v20 = vld [vmem:[%s5616_s28 + $0x60] sm:$0xff] }
0x10b7   : > { %v4581_v22 = vpack.c.bf16 %v2396_v21, %v2395_v20 }
0x10b8   : > { %v2253_v40 = vadd.f32 %v2252_v37, %v5170_v57  ;;  %v2293_v57 = vld [vmem:[%s5609_s6 + $0x10] sm:$0xff] }
0x10b9   : > { %v4560_v52 = vpack.c.bf16 %v2294_v51, %v2293_v57  ;;  %4582 = vmatpush3.bf16.msra.mxu1 %v4581_v22 }
0x10ba   : > { %v5291_v41 = vadd.f32 %v4090_v39, %v2253_v40  ;;  %4583 = vmatprep.subr.bf16.mxu1 %v4877_v3 }
0x10bb   : > { %4561 = vmatpush3.bf16.msra.mxu0 %v4560_v52 }
0x10bc   : > { %v2264_v42 = vsel %vm1143_vm1, %v5291_v41, 0.0  ;;  %4586 = vmatprep.subr.bf16.mxu0 %v4877_v3 }
0x10bd   : > { %2265 = vadd.xlane.f32.xlu1 %v2264_v42  ;;  %4585 = vmatpush3.bf16.msra.mxu1 %v4584_v25 }
0x10be   : > { %4403 = vmatprep.subr.mxu1 %v4879_v6 }
0x114a   : > { %v2266_v43 = vpop.xlane.xlu1 %2265 }
0x114b   : > { %v2267_v44 = vmul.f32 0.03125, %v2266_v43 }
0x114d   : > { %v2268_v45 = vsub.f32 %v5291_v41, %v2267_v44 }
0x114f   : > { %v2269_v46 = vmul.f32 %v2268_v45, %v2268_v45 }
0x1151   : > { %v2270_v47 = vsel %vm1143_vm1, %v2269_v46, 0.0 }
0x1152   : > { %2271 = vadd.xlane.f32.xlu1 %v2270_v47  ;;  %v2506_v47 = vld [vmem:[%s5619_s1] sm:$0xff] }
0x1153   : > { %v4587_v49 = vpack.c.bf16 %v2507_v48, %v2506_v47 }
0x11df   : > { %v2272_v53 = vpop.xlane.xlu1 %2271 }
0x11e0   : > { %v2273_v54 = vmul.f32 0.03125, %v2272_v53 }
0x11e2   : > { %v2274_v55 = vadd.f32 1e-05, %v2273_v54 }
0x11e4   : > { %4747 = vrsqrt.f32 %v2274_v55  ;;  %v4097_v55 = vld [vmem:[%s5620_s11] ss:$0 sm:$0xff]  ;;  %s5626_s11 = smov 120  }
0x11ee   : > { %v4748_v56 = vpop.eup %4747 }
0x11ef   : > { %v2276_v59 = vmul.f32 %v4748_v56, %v2268_v45 }
0x11f1   : > { %v2283_v61 = vmul.f32 %v4091_v58, %v2276_v59  ;;  %v4098_v58 = vld [vmem:[%s5621_s23] ss:$0 sm:$0xff]  ;;  %s5627_s23 = sld [smem:[#allocation18_spill]] }
0x11f3   : > { %v2290_v62 = vadd.f32 %v4092_v60, %v2283_v61  ;;  %v4099_v61 = vld [vmem:[%s5622_s3] ss:$0 sm:$0xff]  ;;  %s5624_s3 = smov 64  }
0x11f5   : > { %4330 = vmatmul.mubr.msk.f32.vlgmr.msra.gmra.mrb[4].mxu0 %vm1212_vm3, %v2290_v62 }
0x11f6   : > { %4375 = vmatprep.mubr.msk.f32.mxu0 %vm4878_vm2, %v4879_v6  ;;  %4588 = vmatpush3.bf16.msra.mxu0 %v4587_v49 }
0x11f7   : > { %4589 = vmatprep.subr.bf16.mxu0 %v4877_v3  ;;  %v2590_v20 = vld [vmem:[%s5627_s23] sm:$0xff] }
0x12c8   : > { %v2371_v27 = vpop.f32.mrb[4].mxu0 }
0x12c9   : > { %v2372_v28 = vadd.f32 %v4093_v26, %v2371_v27  ;;  %v4331_v29 = vpop.f32.mrb[5].mxu0 }
0x12cb   : > { %v4095_v30 = vmul.f32 -1.702, %v2372_v28 }
0x12cd   : > { %v2377_v31 = vmul.f32 1.442695, %v4095_v30 }
0x12cf   : > { %4749 = vpow2.f32 %v2377_v31 }
0x12d9   : > { %v4750_v32 = vpop.eup %4749 }
0x12da   : > { %v2379_v19 = vadd.f32 1.0, %v4750_v32 }
0x12dc   : > { %4751 = vrcp.f32 %v2379_v19 }
0x12e6   : > { %v4752_v33 = vpop.eup %4751 }
0x12e7   : > { %v2382_v34 = vmul.f32 %v4752_v33, %v2372_v28 }
0x12e9   : > { %4365 = vmatmul.mubr.f32.vlgmr.msra.gmra.mrb[24].mxu1 %v2382_v34 }
0x12ea   : > { %4405 = vmatprep.mubr.msk.f32.mxu1 %vm4878_vm2, %v4879_v6  ;;  %4404 = vmatpush3.msra.mxu1 %v2590_v20 }
0x12eb   : > { %4413 = vmatprep.subr.mxu1 %v4879_v6 }
0x13bc   : > { %v2472_v36 = vpop.f32.mrb[24].mxu1 }
0x13bd   : > { %v2473_v37 = vadd.f32 %v4096_v35, %v2472_v36  ;;  %v4366_v38 = vpop.f32.mrb[25].mxu1  ;;  %v2591_v36 = vld [vmem:[%s5627_s23 + $0x8] sm:$0xff] }
0x13bf   : > { %v5337_v39 = vadd.f32 %v2473_v37, %v5291_v41  ;;  %v2508_v41 = vld [vmem:[%s5619_s1 + $0x10] sm:$0xff]  ;;  %s5623_s1 = smov 96  }
0x13c0   : > { %v4590_v57 = vpack.c.bf16 %v2509_v50, %v2508_v41 }
0x13c1   : > { %v2479_v40 = vsel %vm1143_vm1, %v5337_v39, 0.0 }
0x13c2   : > { %2480 = vadd.xlane.f32.xlu1 %v2479_v40  ;;  %4591 = vmatpush3.bf16.msra.mxu0 %v4590_v57 }
0x13c3   : > { %4378 = vmatprep.subr.mxu0 %v4879_v6 }
0x144f   : > { %v2481_v42 = vpop.xlane.xlu1 %2480 }
0x1450   : > { %v2482_v43 = vmul.f32 0.03125, %v2481_v42 }
0x1452   : > { %v2483_v44 = vsub.f32 %v5337_v39, %v2482_v43 }
0x1454   : > { %v2484_v45 = vmul.f32 %v2483_v44, %v2483_v44 }
0x1456   : > { %v2485_v46 = vsel %vm1143_vm1, %v2484_v45, 0.0 }
0x1457   : > { %2486 = vadd.xlane.f32.xlu1 %v2485_v46 }
0x14e4   : > { %v2487_v51 = vpop.xlane.xlu1 %2486 }
0x14e5   : > { %v2488_v52 = vmul.f32 0.03125, %v2487_v51 }
0x14e7   : > { %v2489_v53 = vadd.f32 1e-05, %v2488_v52 }
0x14e9   : > { %4753 = vrsqrt.f32 %v2489_v53 }
0x14f3   : > { %v4754_v54 = vpop.eup %4753 }
0x14f4   : > { %v2491_v56 = vmul.f32 %v4754_v54, %v2483_v44 }
0x14f6   : > { %v2498_v59 = vmul.f32 %v4097_v55, %v2491_v56 }
0x14f8   : > { %v2505_v60 = vadd.f32 %v4098_v58, %v2498_v59  ;;  %v2592_v59 = vld [vmem:[%s5627_s23 + $0x10] sm:$0xff] }
0x14fa   : > { %4376 = vmatmul.mubr.msk.f32.vlgmr.msra.gmra.mrb[6].mxu0 %vm1212_vm3, %v2505_v60 }
0x14fb   : > { %4380 = vmatprep.mubr.msk.f32.mxu0 %vm4878_vm2, %v4879_v6 }
0x15cd   : > { %v2586_v62 = vpop.f32.mrb[6].mxu0 }
0x15ce   : > { %v5355_v63 = vadd.f32 %v4099_v61, %v2586_v62  ;;  %v4377_v0 = vpop.f32.mrb[7].mxu0 }
0x15d0   : > { %2596 = vrot.lane.b32.xlu0 %v5355_v63, %s5623_s1  ;;  %v5361_v2 = vmul.f32 0.35355338, %v5355_v63  ;;  %s5625_s1 = smov 88  }
0x1642   : > { %v2597_v1 = vpop.permute.xlu0 %2596 }
0x1643   : > { %4379 = vmatpush3.xpose.msk.msra.mxu0 %vm1294_vm4, %v2597_v1 }
0x1644   : > { %4383 = vmatprep.subr.mxu0 %v4879_v6 }
0x1646   : > { %4381 = vmatmul.mubr.msk.f32.vlgmr.msra.gmra.mrb[8].mxu0 %vm1294_vm4, %v5361_v2 }
0x1647   : > { %4385 = vmatprep.mubr.msk.f32.mxu0 %vm4878_vm2, %v4879_v6 }
0x1719   : > { %v2669_v4 = vpop.f32.mrb[8].mxu0 }
0x171a   : > { %v4382_v5 = vpop.f32.mrb[9].mxu0  ;;  %v2673_v7 = vsel %vm1370_vm5, %v2669_v4, -inf }
0x171b   : > { %2674 = vmax.xlane.f32.xlu1 %v2673_v7 }
0x172c   : > { %2684 = vrot.lane.b32.xlu1 %v5355_v63, %s5624_s3  ;;  %s5628_s3 = smov 56  }
0x1730   : > { %2763 = vrot.lane.b32.xlu1 %v5355_v63, %s5625_s1  ;;  %s5629_s1 = smov 80  }
0x1734   : > { %2761 = vrot.lane.b32.xlu1 %v5361_v2, %s5626_s11  ;;  %s5630_s11 = smov 112  }
0x17a8   : > { %v2675_v8 = vpop.xlane.xlu1 %2674 }
0x17a9   : > { %v2676_v9 = vsub.f32 %v2669_v4, %v2675_v8 }
0x17ab   : > { %v2677_v10 = vmul.f32 1.442695, %v2676_v9  ;;  %v2593_v9 = vld [vmem:[%s5627_s23 + $0x18] sm:$0xff] }
0x17ac   : > { %v2685_v11 = vpop.permute.xlu1 %2684 }
0x17ad   : > { %4755 = vpow2.f32 %v2677_v10  ;;  %4384 = vmatpush3.msk.msra.mxu0 %vm1388_vm6, %v2685_v11 }
0x17ae   : > { %4388 = vmatprep.subr.mxu0 %v4879_v6 }
0x17b0   : > { %v2764_v16 = vpop.permute.xlu1 %2763 }
0x17b4   : > { %v2762_v18 = vpop.permute.xlu1 %2761 }
0x17b7   : > { %v4756_v12 = vpop.eup %4755 }
0x17b8   : > { %v2679_v13 = vsel %vm1370_vm5, %v4756_v12, 0.0 }
0x17b9   : > { %2680 = vadd.xlane.f32.xlu0 %v2679_v13 }
0x1846   : > { %v2681_v14 = vpop.xlane.xlu0 %2680 }
0x1847   : > { %4757 = vrcp.f32 %v2681_v14 }
0x1851   : > { %v4758_v15 = vpop.eup %4757 }
0x1852   : > { %v2683_v17 = vmul.f32 %v4758_v15, %v4756_v12 }
0x1854   : > { %4386 = vmatmul.mubr.msk.f32.vlgmr.msra.gmra.mrb[10].mxu0 %vm1384_vm7, %v2683_v17 }
0x1855   : > { %4389 = vmatpush3.xpose.msk.msra.mxu0 %vm1294_vm4, %v2764_v16  ;;  %4390 = vmatprep.mubr.msk.f32.mxu0 %vm4878_vm2, %v4879_v6 }
0x1856   : > { %4393 = vmatprep.subr.mxu0 %v4879_v6 }
0x1858   : > { %4391 = vmatmul.mubr.msk.f32.vlgmr.msra.gmra.mrb[12].mxu0 %vm1294_vm4, %v2762_v18 }
0x1859   : > { %4395 = vmatprep.mubr.msk.f32.mxu0 %vm4878_vm2, %v4879_v6 }
0x1927   : > { %v2757_v21 = vpop.f32.mrb[10].mxu0 }
0x1928   : > { %v4387_v22 = vpop.f32.mrb[11].mxu0  ;;  %4406 = vmatmul.mubr.msk.f32.vlgmr.msra.gmra.mrb[26].mxu1 %vm1294_vm4, %v2757_v21 }
0x1929   : > { %4415 = vmatprep.mubr.msk.f32.mxu1 %vm4878_vm2, %v4879_v6 }
0x192b   : > { %v2835_v23 = vpop.f32.mrb[12].mxu0 }
0x192c   : > { %v4392_v24 = vpop.f32.mrb[13].mxu0  ;;  %v2839_v25 = vsel %vm1370_vm5, %v2835_v23, -inf }
0x192d   : > { %2840 = vmax.xlane.f32.xlu1 %v2839_v25 }
0x19ba   : > { %v2841_v26 = vpop.xlane.xlu1 %2840 }
0x19bb   : > { %v2842_v27 = vsub.f32 %v2835_v23, %v2841_v26 }
0x19bd   : > { %v2843_v28 = vmul.f32 1.442695, %v2842_v27 }
0x19bf   : > { %4759 = vpow2.f32 %v2843_v28 }
0x19c9   : > { %v4760_v29 = vpop.eup %4759 }
0x19ca   : > { %v2845_v30 = vsel %vm1370_vm5, %v4760_v29, 0.0 }
0x19cb   : > { %2846 = vadd.xlane.f32.xlu0 %v2845_v30 }
0x19e1   : > { %2850 = vrot.lane.b32.xlu0 %v5355_v63, %s5628_s3  ;;  %s5631_s3 = smov 48  }
0x19e5   : > { %3075 = vrot.lane.b32.xlu0 %v5355_v63, %s5629_s1  ;;  %s5632_s1 = smov 72  }
0x19e9   : > { %3073 = vrot.lane.b32.xlu0 %v5361_v2, %s5630_s11  ;;  %s5633_s11 = smov 104  }
0x19fb   : > { %v3069_v31 = vpop.f32.mrb[26].mxu1 }
0x19fc   : > { %v4407_v32 = vpop.f32.mrb[27].mxu1 }
0x1a58   : > { %v2847_v19 = vpop.xlane.xlu0 %2846 }
0x1a59   : > { %4761 = vrcp.f32 %v2847_v19 }
0x1a5c   : > { %v2851_v33 = vpop.permute.xlu0 %2850 }
0x1a5d   : > { %4394 = vmatpush3.msk.msra.mxu0 %vm1388_vm6, %v2851_v33 }
0x1a5e   : > { %4398 = vmatprep.subr.mxu0 %v4879_v6 }
0x1a60   : > { %v3076_v37 = vpop.permute.xlu0 %3075 }
0x1a63   : > { %v4762_v34 = vpop.eup %4761 }
0x1a64   : > { %v2849_v35 = vmul.f32 %v4762_v34, %v4760_v29  ;;  %v3074_v42 = vpop.permute.xlu0 %3073 }
0x1a66   : > { %4396 = vmatmul.mubr.msk.f32.vlgmr.msra.gmra.mrb[14].mxu0 %vm1384_vm7, %v2849_v35 }
0x1a67   : > { %4399 = vmatpush3.msra.mxu0 %v2591_v36  ;;  %4400 = vmatprep.mubr.msk.f32.mxu0 %vm4878_vm2, %v4879_v6 }
0x1a68   : > { %4408 = vmatprep.subr.mxu0 %v4879_v6 }
0x1b39   : > { %v2923_v38 = vpop.f32.mrb[14].mxu0 }
0x1b3a   : > { %v4397_v40 = vpop.f32.mrb[15].mxu0  ;;  %4401 = vmatmul.mubr.msk.f32.vlgmr.msra.gmra.mrb[16].mxu0 %vm1294_vm4, %v2923_v38 }
0x1b3b   : > { %4409 = vmatpush3.xpose.msk.msra.mxu0 %vm1294_vm4, %v3076_v37  ;;  %4410 = vmatprep.mubr.msk.f32.mxu0 %vm4878_vm2, %v4879_v6 }
0x1b3c   : > { %4418 = vmatprep.subr.mxu0 %v4879_v6 }
0x1b3e   : > { %4411 = vmatmul.mubr.msk.f32.vlgmr.msra.gmra.mrb[18].mxu0 %vm1294_vm4, %v3074_v42 }
0x1b3f   : > { %4420 = vmatprep.mubr.msk.f32.mxu0 %vm4878_vm2, %v4879_v6  ;;  %4419 = vmatpush3.msra.mxu0 %v2592_v59 }
0x1b40   : > { %4428 = vmatprep.subr.mxu0 %v4879_v6 }
0x1c0d   : > { %v2996_v43 = vpop.f32.mrb[16].mxu0 }
0x1c0e   : > { %v3070_v44 = vadd.f32 %v3069_v31, %v2996_v43  ;;  %v4402_v45 = vpop.f32.mrb[17].mxu0 }
0x1c11   : > { %v3147_v46 = vpop.f32.mrb[18].mxu0 }
0x1c12   : > { %v4412_v47 = vpop.f32.mrb[19].mxu0  ;;  %v3151_v48 = vsel %vm1370_vm5, %v3147_v46, -inf }
0x1c13   : > { %3152 = vmax.xlane.f32.xlu1 %v3151_v48  ;;  %v3684_v47 = vld [vmem:[%s5639_s5 + $0x8] sm:$0xff] }
0x1c24   : > { %3162 = vrot.lane.b32.xlu1 %v5355_v63, %s5631_s3  ;;  %s5634_s3 = smov 40  }
0x1c28   : > { %3315 = vrot.lane.b32.xlu1 %v5355_v63, %s5632_s1  ;;  %s5635_s1 = sld [smem:[#allocation19_spill]] }
0x1c2c   : > { %3313 = vrot.lane.b32.xlu1 %v5361_v2, %s5633_s11  ;;  %s5636_s11 = sld [smem:[#allocation22_spill]] }
0x1c2e   : > { %v4121_v22 = vld [vmem:[%s5635_s1] ss:$0 sm:$0xff]  ;;  %s5638_s1 = sld [smem:[#allocation21_spill]] }
0x1c32   : > { %v3591_v31 = vld [vmem:[%s5636_s11] sm:$0xff]  ;;  %v3592_v32 = vld [vmem:[%s5636_s11 + $0x8] sm:$0xff]  ;;  %v3594_v33 = vld [vmem:[%s5636_s11 + $0x18] sm:$0xff] }
0x1c33   : > { %v4593_v19 = vpack.c.bf16 %v3592_v32, %v3591_v31  ;;  %v3796_v31 = vld [vmem:[%s5055_s20 + $0x8] sm:$0xff] }
0x1c34   : > { %v4123_v43 = vld [vmem:[%s5638_s1] ss:$0 sm:$0xff]  ;;  %s5641_s1 = sld [smem:[#allocation25_spill]] }
0x1ca0   : > { %v3153_v49 = vpop.xlane.xlu1 %3152 }
0x1ca1   : > { %v3154_v41 = vsub.f32 %v3147_v46, %v3153_v49  ;;  %v3683_v46 = vld [vmem:[%s5639_s5] sm:$0xff]  ;;  %v3685_v49 = vld [vmem:[%s5639_s5 + $0x10] sm:$0xff] }
0x1ca2   : > { %v4599_v48 = vpack.c.bf16 %v3684_v47, %v3683_v46  ;;  %v3874_v47 = vld [vmem:[%s5060_s27 + $0x10] sm:$0xff] }
0x1ca3   : > { %v3155_v50 = vmul.f32 1.442695, %v3154_v41  ;;  %v3686_v41 = vld [vmem:[%s5639_s5 + $0x18] sm:$0xff] }
0x1ca4   : > { %v3163_v57 = vpop.permute.xlu1 %3162 }
0x1ca5   : > { %4763 = vpow2.f32 %v3155_v50  ;;  %4414 = vmatpush3.msk.msra.mxu1 %vm1388_vm6, %v3163_v57  ;;  %v4602_v50 = vpack.c.bf16 %v3686_v41, %v3685_v49  ;;  %v3687_v57 = vld [vmem:[%s5639_s5 + $0x20] sm:$0xff] }
0x1ca6   : > { %4423 = vmatprep.subr.mxu1 %v4879_v6  ;;  %v3876_v41 = vld [vmem:[%s5060_s27 + $0x20] sm:$0xff] }
0x1ca8   : > { %v3316_v55 = vpop.permute.xlu1 %3315 }
0x1cac   : > { %v3314_v58 = vpop.permute.xlu1 %3313 }
0x1caf   : > { %v4764_v51 = vpop.eup %4763 }
0x1cb0   : > { %v3157_v52 = vsel %vm1370_vm5, %v4764_v51, 0.0 }
0x1cb1   : > { %3158 = vadd.xlane.f32.xlu0 %v3157_v52 }
0x1d3e   : > { %v3159_v53 = vpop.xlane.xlu0 %3158 }
0x1d3f   : > { %4765 = vrcp.f32 %v3159_v53  ;;  %v3689_v53 = vld [vmem:[%s5639_s5 + $0x30] sm:$0xff] }
0x1d49   : > { %v4766_v54 = vpop.eup %4765 }
0x1d4a   : > { %v3161_v56 = vmul.f32 %v4766_v54, %v4764_v51  ;;  %v3688_v51 = vld [vmem:[%s5639_s5 + $0x28] sm:$0xff]  ;;  %v3690_v54 = vld [vmem:[%s5639_s5 + $0x38] sm:$0xff] }
0x1d4b   : > { %v4605_v52 = vpack.c.bf16 %v3688_v51, %v3687_v57  ;;  %v3878_v51 = vld [vmem:[%s5060_s27 + $0x30] sm:$0xff] }
0x1d4c   : > { %4416 = vmatmul.mubr.msk.f32.vlgmr.msra.gmra.mrb[28].mxu1 %vm1384_vm7, %v3161_v56  ;;  %v3691_v56 = vld [vmem:[%s5639_s5 + $0x40] sm:$0xff] }
0x1d4d   : > { %4424 = vmatpush3.xpose.msk.msra.mxu1 %vm1294_vm4, %v3316_v55  ;;  %4425 = vmatprep.mubr.msk.f32.mxu1 %vm4878_vm2, %v4879_v6  ;;  %v4608_v55 = vpack.c.bf16 %v3690_v54, %v3689_v53 }
0x1d4e   : > { %4433 = vmatprep.subr.mxu1 %v4879_v6 }
0x1d50   : > { %4426 = vmatmul.mubr.msk.f32.vlgmr.msra.gmra.mrb[30].mxu1 %vm1294_vm4, %v3314_v58  ;;  %v3692_v58 = vld [vmem:[%s5639_s5 + $0x48] sm:$0xff] }
0x1d51   : > { %4435 = vmatprep.mubr.msk.f32.mxu1 %vm4878_vm2, %v4879_v6  ;;  %4434 = vmatpush3.msra.mxu1 %v2593_v9  ;;  %v4611_v59 = vpack.c.bf16 %v3692_v58, %v3691_v56 }
0x1d52   : > { %4598 = vmatprep.subr.bf16.mxu1 %v4877_v3 }
0x1e1f   : > { %v3235_v60 = vpop.f32.mrb[28].mxu1 }
0x1e20   : > { %v4417_v61 = vpop.f32.mrb[29].mxu1  ;;  %4421 = vmatmul.mubr.msk.f32.vlgmr.msra.gmra.mrb[20].mxu0 %vm1294_vm4, %v3235_v60  ;;  %v3693_v60 = vld [vmem:[%s5639_s5 + $0x50] sm:$0xff] }
0x1e21   : > { %4430 = vmatprep.mubr.msk.f32.mxu0 %vm4878_vm2, %v4879_v6  ;;  %v3694_v61 = vld [vmem:[%s5639_s5 + $0x58] sm:$0xff] }
0x1e23   : > { %v3387_v62 = vpop.f32.mrb[30].mxu1 }
0x1e24   : > { %v4427_v0 = vpop.f32.mrb[31].mxu1  ;;  %v3391_v1 = vsel %vm1370_vm5, %v3387_v62, -inf }
0x1e25   : > { %3392 = vmax.xlane.f32.xlu1 %v3391_v1  ;;  %v3695_v0 = vld [vmem:[%s5639_s5 + $0x60] sm:$0xff]  ;;  %v3696_v1 = vld [vmem:[%s5639_s5 + $0x68] sm:$0xff] }
0x1eb2   : > { %v3393_v2 = vpop.xlane.xlu1 %3392 }
0x1eb3   : > { %v3394_v4 = vsub.f32 %v3387_v62, %v3393_v2  ;;  %v4614_v62 = vpack.c.bf16 %v3694_v61, %v3693_v60  ;;  %v4617_v2 = vpack.c.bf16 %v3696_v1, %v3695_v0 }
0x1eb5   : > { %v3395_v5 = vmul.f32 1.442695, %v3394_v4  ;;  %v3697_v4 = vld [vmem:[%s5639_s5 + $0x70] sm:$0xff] }
0x1eb7   : > { %4767 = vpow2.f32 %v3395_v5  ;;  %v3698_v5 = vld [vmem:[%s5639_s5 + $0x78] sm:$0xff] }
0x1ec1   : > { %v4768_v7 = vpop.eup %4767 }
0x1ec2   : > { %v3397_v8 = vsel %vm1370_vm5, %v4768_v7, 0.0 }
0x1ec3   : > { %3398 = vadd.xlane.f32.xlu0 %v3397_v8 }
0x1ed9   : > { %3402 = vrot.lane.b32.xlu0 %v5355_v63, %s5634_s3  ;;  %s5637_s3 = sld [smem:[#allocation20_spill]] }
0x1edf   : > { %v4122_v40 = vld [vmem:[%s5637_s3] ss:$0 sm:$0xff]  ;;  %s5640_s3 = sld [smem:[#allocation23_spill]] }
0x1ee5   : > { %v4124_v8 = vld [vmem:[%s5640_s3] ss:$0 sm:$0xff]  ;;  %s5642_s3 = sld [smem:[#allocation26_spill]] }
0x1ef3   : > { %v3308_v10 = vpop.f32.mrb[20].mxu0 }
0x1ef4   : > { %v3312_v11 = vadd.f32 %v3308_v10, %v3070_v44  ;;  %v4422_v12 = vpop.f32.mrb[21].mxu0 }
0x1f50   : > { %v3399_v13 = vpop.xlane.xlu0 %3398 }
0x1f51   : > { %4769 = vrcp.f32 %v3399_v13 }
0x1f54   : > { %v3403_v14 = vpop.permute.xlu0 %3402 }
0x1f55   : > { %4429 = vmatpush3.msk.msra.mxu0 %vm1388_vm6, %v3403_v14 }
0x1f56   : > { %4592 = vmatprep.subr.bf16.mxu0 %v4877_v3 }
0x1f5b   : > { %v4770_v15 = vpop.eup %4769 }
0x1f5c   : > { %v3401_v16 = vmul.f32 %v4770_v15, %v4768_v7  ;;  %v4620_v7 = vpack.c.bf16 %v3698_v5, %v3697_v4 }
0x1f5e   : > { %4431 = vmatmul.mubr.msk.f32.vlgmr.msra.gmra.mrb[22].mxu0 %vm1384_vm7, %v3401_v16 }
0x1f5f   : > { %4446 = vmatprep.mubr.msk.f32.mxu0 %vm4878_vm2, %v4879_v6  ;;  %4594 = vmatpush3.bf16.msra.mxu0 %v4593_v19  ;;  %v3797_v19 = vld [vmem:[%s5055_s20 + $0x10] sm:$0xff] }
0x1f60   : > { %4595 = vmatprep.subr.bf16.mxu0 %v4877_v3 }
0x2031   : > { %v3475_v63 = vpop.f32.mrb[22].mxu0 }
0x2032   : > { %v4432_v17 = vpop.f32.mrb[23].mxu0  ;;  %4436 = vmatmul.mubr.msk.f32.vlgmr.msra.gmra.mrb[32].mxu1 %vm1294_vm4, %v3475_v63 }
0x2033   : > { %4481 = vmatprep.mubr.msk.f32.mxu1 %vm4878_vm2, %v4879_v6  ;;  %4600 = vmatpush3.bf16.msra.mxu1 %v4599_v48  ;;  %v4127_v17 = vld [vmem:[%s5641_s1] ss:$0 sm:$0xff]  ;;  %s5643_s1 = sld [smem:[#allocation27_spill]]  ;;  %v3875_v48 = vld [vmem:[%s5060_s27 + $0x18] sm:$0xff] }
0x2034   : > { %4601 = vmatprep.subr.bf16.mxu1 %v4877_v3  ;;  %v4632_v49 = vpack.c.bf16 %v3875_v48, %v3874_v47 }
0x2037   : > { %4603 = vmatpush3.bf16.msra.mxu1 %v4602_v50  ;;  %v3877_v50 = vld [vmem:[%s5060_s27 + $0x28] sm:$0xff] }
0x2038   : > { %4604 = vmatprep.subr.bf16.mxu1 %v4877_v3  ;;  %v4635_v57 = vpack.c.bf16 %v3877_v50, %v3876_v41 }
0x203b   : > { %4606 = vmatpush3.bf16.msra.mxu1 %v4605_v52  ;;  %v3879_v52 = vld [vmem:[%s5060_s27 + $0x38] sm:$0xff] }
0x203c   : > { %4607 = vmatprep.subr.bf16.mxu1 %v4877_v3  ;;  %v4638_v53 = vpack.c.bf16 %v3879_v52, %v3878_v51 }
0x203f   : > { %4609 = vmatpush3.bf16.msra.mxu1 %v4608_v55  ;;  %v3880_v55 = vld [vmem:[%s5644_s4] sm:$0x1] }
0x2040   : > { %4610 = vmatprep.subr.bf16.mxu1 %v4877_v3 }
0x2043   : > { %4612 = vmatpush3.bf16.msra.mxu1 %v4611_v59 }
0x2044   : > { %4613 = vmatprep.subr.bf16.mxu1 %v4877_v3 }
0x2047   : > { %4615 = vmatpush3.bf16.msra.mxu1 %v4614_v62 }
0x2048   : > { %4616 = vmatprep.subr.bf16.mxu1 %v4877_v3 }
0x204b   : > { %4618 = vmatpush3.bf16.msra.mxu1 %v4617_v2 }
0x204c   : > { %4619 = vmatprep.subr.bf16.mxu1 %v4877_v3 }
0x204f   : > { %4621 = vmatpush3.bf16.msra.mxu1 %v4620_v7 }
0x2105   : > { %v3548_v18 = vpop.f32.mrb[32].mxu1 }
0x2106   : > { %v3552_v20 = vadd.f32 %v3548_v18, %v3312_v11  ;;  %v4437_v21 = vpop.f32.mrb[33].mxu1 }
0x2108   : > { %v3553_v23 = vadd.f32 %v3552_v20, %v5337_v39  ;;  %v3593_v39 = vld [vmem:[%s5636_s11 + $0x10] sm:$0xff] }
0x2109   : > { %v4596_v34 = vpack.c.bf16 %v3594_v33, %v3593_v39 }
0x210a   : > { %v5453_v24 = vadd.f32 %v4121_v22, %v3553_v23 }
0x210b   : > { %4597 = vmatpush3.bf16.msra.mxu0 %v4596_v34 }
0x210c   : > { %v3564_v25 = vsel %vm1143_vm1, %v5453_v24, 0.0  ;;  %4622 = vmatprep.subr.bf16.mxu0 %v4877_v3 }
0x210d   : > { %3565 = vadd.xlane.f32.xlu0 %v3564_v25 }
0x219a   : > { %v3566_v26 = vpop.xlane.xlu0 %3565 }
0x219b   : > { %v3567_v27 = vmul.f32 0.03125, %v3566_v26 }
0x219d   : > { %v3568_v28 = vsub.f32 %v5453_v24, %v3567_v27 }
0x219f   : > { %v3569_v29 = vmul.f32 %v3568_v28, %v3568_v28 }
0x21a1   : > { %v3570_v30 = vsel %vm1143_vm1, %v3569_v29, 0.0 }
0x21a2   : > { %3571 = vadd.xlane.f32.xlu1 %v3570_v30  ;;  %v3795_v30 = vld [vmem:[%s5055_s20] sm:$0xff] }
0x21a3   : > { %v4623_v32 = vpack.c.bf16 %v3796_v31, %v3795_v30 }
0x222f   : > { %v3572_v35 = vpop.xlane.xlu1 %3571 }
0x2230   : > { %v3573_v36 = vmul.f32 0.03125, %v3572_v35 }
0x2232   : > { %v3574_v37 = vadd.f32 1e-05, %v3573_v36 }
0x2234   : > { %4771 = vrsqrt.f32 %v3574_v37  ;;  %v3777_v37 = vld [vmem:[%s5642_s3] sm:$0x1]  ;;  %s1033_s3 = sand.u32 1, %s4833_s16  }
0x2235   : > { %s1034_s5 = scalar_lea.vmem [#allocation2], %s1033_s3  ;;  %s3956_s9 = scalar_lea.sflag [#allocation3], %s1033_s3 }
0x2236   : > { %s3968_s6 = sshll.u32 %s1034_s5, 4  ;;  %s5525_s6 = int_to_ptr.vmem [resolvable:$true] %s3968_s6 }
0x2237   : > { %s4779_s11 = scalar_lea.vmem %s5525_s6, 16 }
0x2238   : > { %p4780_p11 = scmp.ne.s32.totalorder %s5525_s6, %s4779_s11 }
0x223a   : > { %p4781_p12 = pnand %p4780_p11, %p5110_p5 }
0x223c   : > { %p4782_p13 = pneg %p4781_p12 }
0x223e   : > { %v4772_v38 = vpop.eup %4771 }
0x223f   : > { %v3576_v42 = vmul.f32 %v4772_v38, %v3568_v28 }
0x2241   : > { %v3583_v44 = vmul.f32 %v4122_v40, %v3576_v42  ;;  %v3872_v40 = vld [vmem:[%s5060_s27] sm:$0xff]  ;;  %v3873_v42 = vld [vmem:[%s5060_s27 + $0x8] sm:$0xff] }
0x2243   : > { %v3590_v45 = vadd.f32 %v4123_v43, %v3583_v44  ;;  %v3778_v43 = vld [vmem:[%s5643_s1] sm:$0x1]  ;;  %s4130_s1 = sshll.u32 %s5093_s0, 4  ;;  %s4891_s0 = smov [#allocation2]  }
0x2244   : > { %s5523_s8 = scalar_lea.hbm %s5070_s12, %s4130_s1  ;;  %s4783_s4 = sshll.u32 %s4891_s0, 4  ;;  %s4784_s4 = int_to_ptr.vmem [resolvable:$false] %s4783_s4 }
0x2245   : > { %4447 = vmatmul.mubr.msk.f32.vlgmr.msra.gmra.mrb[24].mxu0 %vm1212_vm3, %v3590_v45  ;;  %v4629_v45 = vpack.c.bf16 %v3873_v42, %v3872_v40  ;;  %s4785_s13 = scalar_lea.vmem %s4784_s4, 32  ;;  %p4786_p0 = scmp.lt.s32.totalorder %s5525_s6, %s4784_s4 }
0x2246   : > { %4492 = vmatprep.mubr.msk.f32.mxu0 %vm4878_vm2, %v4879_v6  ;;  %4624 = vmatpush3.bf16.msra.mxu0 %v4623_v32  ;;  %p4787_p1 = scmp.lt.s32.totalorder %s4785_s13, %s4779_s11 }
0x2247   : > { %4625 = vmatprep.subr.bf16.mxu0 %v4877_v3 }
0x2248   : > { %p4788_p2 = por %p4787_p1, %p4786_p0 }
0x224a   : > { %p4789_p3 = pnand %p4788_p2, %p4782_p13 }
0x2318   : > { %v3671_v9 = vpop.f32.mrb[24].mxu0 }
0x2319   : > { %v3672_v10 = vadd.f32 %v4124_v8, %v3671_v9  ;;  %v4448_v11 = vpop.f32.mrb[25].mxu0 }
0x231b   : > { %v4126_v12 = vmul.f32 -1.702, %v3672_v10 }
0x231d   : > { %v3677_v13 = vmul.f32 1.442695, %v4126_v12 }
0x231f   : > { %4773 = vpow2.f32 %v3677_v13 }
0x2329   : > { %v4774_v14 = vpop.eup %4773 }
0x232a   : > { %v3679_v15 = vadd.f32 1.0, %v4774_v14 }
0x232c   : > { %4775 = vrcp.f32 %v3679_v15 }
0x2336   : > { %v4776_v16 = vpop.eup %4775 }
0x2337   : > { %v3682_v63 = vmul.f32 %v4776_v16, %v3672_v10 }
0x2339   : > { %4482 = vmatmul.mubr.f32.vlgmr.msra.gmra.mrb[34].mxu1 %v3682_v63 }
0x240c   : > { %v3772_v18 = vpop.f32.mrb[34].mxu1 }
0x240d   : > { %v3773_v20 = vadd.f32 %v4127_v17, %v3772_v18  ;;  %v4483_v21 = vpop.f32.mrb[35].mxu1 }
0x240f   : > { %v3776_v22 = vadd.f32 %v3773_v20, %v5453_v24  ;;  %v3798_v24 = vld [vmem:[%s5055_s20 + $0x18] sm:$0xff] }
0x2410   : > { %v4626_v39 = vpack.c.bf16 %v3798_v24, %v3797_v19 }
0x2411   : > { %v3780_v23 = vsel %vm3779_vm8, %v3776_v22, 0.0 }
0x2412   : > { %3781 = vadd.xlane.f32.xlu1 %v3780_v23  ;;  %4627 = vmatpush3.bf16.msra.mxu0 %v4626_v39 }
0x2413   : > { %4628 = vmatprep.subr.bf16.mxu0 %v4877_v3 }
0x249f   : > { %v3782_v25 = vpop.xlane.xlu1 %3781 }
0x24a0   : > { %v3783_v26 = vmul.f32 0.03125, %v3782_v25 }
0x24a2   : > { %v3784_v27 = vsub.f32 %v3776_v22, %v3783_v26 }
0x24a4   : > { %v3785_v28 = vmul.f32 %v3784_v27, %v3784_v27 }
0x24a6   : > { %v3786_v29 = vsel %vm3779_vm8, %v3785_v28, 0.0 }
0x24a7   : > { %3787 = vadd.xlane.f32.xlu1 %v3786_v29 }
0x2534   : > { %v3788_v33 = vpop.xlane.xlu1 %3787 }
0x2535   : > { %v3789_v34 = vmul.f32 0.03125, %v3788_v33 }
0x2537   : > { %v3790_v35 = vadd.f32 1e-05, %v3789_v34 }
0x2539   : > { %4777 = vrsqrt.f32 %v3790_v35 }
0x2543   : > { %v4778_v36 = vpop.eup %4777 }
0x2544   : > { %v3792_v38 = vmul.f32 %v4778_v36, %v3784_v27 }
0x2546   : > { %v3793_v44 = vmul.f32 %v3792_v38, %v3777_v37 }
0x2548   : > { %v3794_v46 = vadd.f32 %v3793_v44, %v3778_v43 }
0x254a   : > { %4493 = vmatmul.mubr.msk.f32.vlgmr.msra.gmra.mrb[26].mxu0 %vm1212_vm3, %v3794_v46 }
0x254b   : > { %4630 = vmatpush3.bf16.msra.mxu0 %v4629_v45  ;;  %4511 = vmatprep.mubr.msk.f32.mxu0 %vm4878_vm2, %v4879_v6 }
0x254c   : > { %4631 = vmatprep.subr.bf16.mxu0 %v4877_v3 }
0x254f   : > { %4633 = vmatpush3.bf16.msra.mxu0 %v4632_v49 }
0x2550   : > { %4634 = vmatprep.subr.bf16.mxu0 %v4877_v3 }
0x2553   : > { %4636 = vmatpush3.bf16.msra.mxu0 %v4635_v57 }
0x2554   : > { %4637 = vmatprep.subr.bf16.mxu0 %v4877_v3 }
0x2557   : > { %4639 = vmatpush3.bf16.msra.mxu0 %v4638_v53 }
0x261d   : > { %v3868_v6 = vpop.f32.mrb[26].mxu0 }
0x261e   : > { %v4494_v54 = vpop.f32.mrb[27].mxu0  ;;  %4512 = vmatmul.mubr.msk.f32.vlgmr.msra.gmra.mrb[28].mxu0 %vm1067_vm0, %v3868_v6 }
0x26f1   : > { %v3950_v56 = vpop.f32.mrb[28].mxu0 }
0x26f2   : > { %v3951_v58 = vadd.f32 %v3950_v56, %v3880_v55  ;;  %v4513_v59 = vpop.f32.mrb[29].mxu0 }
0x26f4   : > { %3954 = vst [vmem:[%s1034_s5] sm:$0x1] %v3951_v58 }
0x26f5   : > { %4792 = shalt.err (!%p4789_p3)
}
0x26f6   : > { %s4793_s5 = scalar_lea.hbm %s5523_s8, 16  ;;  %s4797_s3 = scalar_lea.hbm %s5070_s12, 64 }
0x26f7   : > { %p4794_p4 = scmp.ne.s32.totalorder %s5523_s8, %s4793_s5  ;;  %p4798_p9 = scmp.lt.u32.totalorder %s5523_s8, %s5070_s12 }
0x26f8   : > { %p4799_p10 = scmp.lt.u32.totalorder %s4797_s3, %s4793_s5  ;;  %p4801_p12 = scmp.lt.u32.totalorder %s4793_s5, %s5523_s8 }
0x26f9   : > { %p4795_p7 = pnand %p4794_p4, %p5110_p5 }
0x26fa   : > { %p4800_p11 = por %p4799_p10, %p4798_p9 }
0x26fb   : > { %p4796_p8 = pneg %p4795_p7 }
0x26fc   : > { %p4802_p0 = por %p4801_p12, %p4800_p11 }
0x26fe   : > { %p4803_p13 = pnand %p4802_p0, %p4796_p8 }
0x2700   : > { %4806 = shalt.err (!%p4803_p13)
}
0x2701   : > { %4640 = dma.vmem_to_hbm [thread:$0]  (%p5110_p5), %s5525_s6, 16, %s5523_s8, %s3956_s9  }
0x2702 PF: > { %p4646_p1 = scmp.ge.s32.totalorder %s4841_s22, 2  ;;  %s3980_s13 = sand.u32 1, %s4829_s15  }
0x2703   : > { %s3981_s4 = scalar_lea.sflag [#allocation3], %s3980_s13 }
0x2704   : > { %p4643_p2 = pnand %p4646_p1, %p5114_p6 }
0x2706   : > { %4824 = dma.done.wait (!%p4643_p2), %s3981_s4, 16  }
0x2707   : > { %4826 = vsyncadd (!%p4643_p2), %s3981_s4, 4294967280  ;;  %p79_p3 = scmp.ge.s32.totalorder %s5097_s26, 6   ;;  %s5645_s15 = smov %s4833_s16 }
0x2708   : > { %s5646_s16 = smov %s4837_s18  ;;  %s5647_s18 = smov %s5108_s2 }
0x2709   : > { %s5648_s22 = smov %s5097_s26  ;;  %81 = sbr.rel (!%p79_p3) target bundleno = 73 (0x49), region = 225 }
0x2710   :  { %3985 = vsyncpa [#allocation3], 1 }
0x2711   :  { %3987 = vsyncpa [#allocation3 + $0x1], 1 }

</bundles_post_ra>
